<compile_context>
chip_gen: v7x
topology: tpu7x:2x2x1
jax: 0.10.0
libtpu: 0.0.40
codegen_flags: <defaults>
</compile_context>

<pallas_src>
import functools

import jax
import jax.numpy as jnp
from jax import lax
from jax.experimental import pallas as pl
from jax.experimental.pallas import tpu as pltpu

_EPS = 1e-5
NCLS_PAD = 8                      # classifier rows padded to one f32 sublane tile
_MAX_BLOCK_TOKENS = 2048          # full-res tokens per grid block (VMEM-safe everywhere)

# Row registry for the packed 1-D parameter slab (order must match _pack_params).
(PE_B, PE_LN_G, PE_LN_B, B1_LN_G, B1_LN_B, B1_B1, B1_B2,
 MRG_LN_G, MRG_LN_B, MRG_B, B2_LN_G, B2_LN_B, B2_B1, B2_B2,
 OUT1_G, OUT1_B, OUT2_G, OUT2_B, P1_B, P2_B, RES_B) = range(21)
_N_VEC_ROWS = 21


def _slab_dims(d1, d2):
    vw = max(4 * d1, 2 * d2, NCLS_PAD, 128)
    vw = ((vw + 127) // 128) * 128
    nv = ((_N_VEC_ROWS + 7) // 8) * 8
    return nv, vw


# ----------------------------------------------------------------------------
# In-kernel helpers (all math in f32; weight refs may be bf16)
# ----------------------------------------------------------------------------
def _ln(x, g, b):
    mu = jnp.mean(x, axis=-1, keepdims=True)
    var = jnp.mean(jnp.square(x - mu), axis=-1, keepdims=True)
    return (x - mu) * lax.rsqrt(var + _EPS) * g + b


def _lin(x, w_ref, b):
    return jnp.dot(x, w_ref[...].astype(jnp.float32),
                   preferred_element_type=jnp.float32) + b


# ----------------------------------------------------------------------------
# The single fused kernel: one image-row block per grid step.
# Token rows inside a block are quadrant-major: ((dy*2+dx)*trh + r2)*wph + c2.
# ----------------------------------------------------------------------------
def _segmentor_kernel(tok_ref, vec_ref, pe_w, b1w1, b1w2, mrg_w, b2w1, b2w2,
                      p1w, p2w, res_w, cls_ref, o_ref, *, d1, d2, ch2):
    f32 = jnp.float32

    def v(row, n):                                   # (1, n) f32 row from the param slab
        return vec_ref[row:row + 1, 0:n]

    x = tok_ref[0].astype(f32)                       # (ch1, K1) quadrant-major tokens

    # ---- backbone stage 1: patch embed + LN + pre-LN residual MLP block ----
    t = _lin(x, pe_w, v(PE_B, d1))
    t = _ln(t, v(PE_LN_G, d1), v(PE_LN_B, d1))
    h = _ln(t, v(B1_LN_G, d1), v(B1_LN_B, d1))
    h = _lin(h, b1w1, v(B1_B1, 2 * d1))
    h = jax.nn.gelu(h)   # tanh-approx GELU (synthetic block); approximate=False for erf parity
    h = _lin(h, b1w2, v(B1_B2, d1))
    tok1 = t + h                                     # (ch1, d1) full-res tokens (f32, VMEM)

    # ---- backbone stage 2: 2x2 patch merge (contiguous quadrant slices) + LN + linear + block ----
    xq = [tok1[k * ch2:(k + 1) * ch2, :] for k in range(4)]
    inv_n = 1.0 / (4.0 * d1)
    mu = sum(jnp.sum(q, axis=-1, keepdims=True) for q in xq) * inv_n
    var = sum(jnp.sum(jnp.square(q - mu), axis=-1, keepdims=True) for q in xq) * inv_n
    rstd = lax.rsqrt(var + _EPS)
    g_all, bt_all = v(MRG_LN_G, 4 * d1), v(MRG_LN_B, 4 * d1)
    mrg = mrg_w[...].astype(f32)                     # (4*d1, d2), 2x2 flatten is (dy, dx) row-major
    t2 = v(MRG_B, d2)
    for k in range(4):
        qn = ((xq[k] - mu) * rstd * g_all[:, k * d1:(k + 1) * d1]
              + bt_all[:, k * d1:(k + 1) * d1])
        t2 = t2 + jnp.dot(qn, mrg[k * d1:(k + 1) * d1, :], preferred_element_type=f32)
    h2 = _ln(t2, v(B2_LN_G, d2), v(B2_LN_B, d2))
    h2 = _lin(h2, b2w1, v(B2_B1, 2 * d2))
    h2 = jax.nn.gelu(h2)
    h2 = _lin(h2, b2w2, v(B2_B2, d2))
    tok2 = t2 + h2                                   # (ch2, d2) half-res tokens (f32, VMEM)

    # ---- decode head: per-scale LN + proj, free 2x nearest upsample, residual MLP, cls ----
    f1 = _lin(_ln(tok1, v(OUT1_G, d1), v(OUT1_B, d1)), p1w, v(P1_B, d1))     # (ch1, d1)
    f2 = _lin(_ln(tok2, v(OUT2_G, d2), v(OUT2_B, d2)), p2w, v(P2_B, d1))     # (ch2, d1)
    f2_up = jnp.concatenate([f2, f2, f2, f2], axis=0)   # nearest-2x == 4x row tile in quadrant order
    fused = f1 + f2_up
    fused = fused + jnp.maximum(_lin(fused, res_w, v(RES_B, d1)), 0.0)
    cls = cls_ref[...]                                   # (NCLS_PAD, d1+1) f32, bias in last column
    logits = lax.dot_general(cls[:, :d1], fused, (((1,), (1,)), ((), ())),
                             preferred_element_type=f32) + cls[:, d1:]
    o_ref[0] = logits.astype(o_ref.dtype)                # class-major (NCLS_PAD, ch1), lane-dense


# ----------------------------------------------------------------------------
# Host-side helpers
# ----------------------------------------------------------------------------
def _pick_rows(B, Hp, Wp, max_tokens=_MAX_BLOCK_TOKENS):
    """Pick tr = full-res patch rows per block: even divisor of Hp, VMEM-sized,
    >=2 grid blocks where possible (v7x megacore), 16/8-aligned token counts."""
    cands = [tr for tr in range(2, Hp + 1, 2)
             if Hp % tr == 0 and (tr * Wp) % 8 == 0]
    assert cands, "patch grid too small/odd for 2x2 merging blocks"

    def score(tr):
        ch1 = tr * Wp
        ch2 = (tr // 2) * (Wp // 2)
        fits = ch1 <= max_tokens
        return (fits,
                B * (Hp // tr) >= 2,
                ch1 % 16 == 0 and ch2 % 8 == 0,
                ch1 if fits else -ch1)

    return max(cands, key=score)


def _pack_params(params, d1, d2, num_classes):
    nv, vw = _slab_dims(d1, d2)
    rows = [
        params["pe_b"], params["pe_ln_g"], params["pe_ln_b"],
        params["blk1"]["ln_g"], params["blk1"]["ln_b"],
        params["blk1"]["b1"], params["blk1"]["b2"],
        params["merge_ln_g"], params["merge_ln_b"], params["merge_b"],
        params["blk2"]["ln_g"], params["blk2"]["ln_b"],
        params["blk2"]["b1"], params["blk2"]["b2"],
        params["out_ln1_g"], params["out_ln1_b"],
        params["out_ln2_g"], params["out_ln2_b"],
        params["proj1_b"], params["proj2_b"], params["res_b"],
    ]
    assert len(rows) == _N_VEC_ROWS
    slab = jnp.zeros((nv, vw), jnp.float32)
    for i, r in enumerate(rows):
        slab = slab.at[i, :r.shape[0]].set(r.astype(jnp.float32))
    # Classifier packed class-major, learned bias wired into the extra last column.
    cls_cm = jnp.zeros((NCLS_PAD, d1 + 1), jnp.float32)
    cls_cm = cls_cm.at[:num_classes, :d1].set(params["cls_w"].astype(jnp.float32).T)
    cls_cm = cls_cm.at[:num_classes, d1].set(params["cls_b"].astype(jnp.float32))
    return slab, cls_cm


# ----------------------------------------------------------------------------
# Parameters (deterministic, synthetic) — matrices bf16, 1-D params f32
# ----------------------------------------------------------------------------
def init_params(key, c_in=3, d1=32, d2=64, num_classes=4, p=4):
    ks = jax.random.split(key, 12)

    def w(k, shape, scale=0.02):
        return (scale * jax.random.normal(k, shape, jnp.float32)).astype(jnp.bfloat16)

    zeros = lambda n: jnp.zeros((n,), jnp.float32)
    ones = lambda n: jnp.ones((n,), jnp.float32)

    return {
        "pe_w": w(ks[0], (c_in * p * p, d1)), "pe_b": zeros(d1),
        "pe_ln_g": ones(d1), "pe_ln_b": zeros(d1),
        "blk1": dict(ln_g=ones(d1), ln_b=zeros(d1),
                     w1=w(ks[1], (d1, 2 * d1)), b1=zeros(2 * d1),
                     w2=w(ks[2], (2 * d1, d1)), b2=zeros(d1)),
        "merge_ln_g": ones(4 * d1), "merge_ln_b": zeros(4 * d1),
        "merge_w": w(ks[3], (4 * d1, d2)), "merge_b": zeros(d2),
        "blk2": dict(ln_g=ones(d2), ln_b=zeros(d2),
                     w1=w(ks[4], (d2, 2 * d2)), b1=zeros(2 * d2),
                     w2=w(ks[5], (2 * d2, d2)), b2=zeros(d2)),
        "out_ln1_g": ones(d1), "out_ln1_b": zeros(d1),
        "out_ln2_g": ones(d2), "out_ln2_b": zeros(d2),
        "proj1_w": w(ks[6], (d1, d1)), "proj1_b": zeros(d1),
        "proj2_w": w(ks[7], (d2, d1)), "proj2_b": zeros(d1),
        "res_w": w(ks[8], (d1, d1)), "res_b": zeros(d1),
        "cls_w": w(ks[9], (d1, num_classes)),
        "cls_b": 0.01 * jax.random.normal(ks[10], (num_classes,), jnp.float32),
    }


# ----------------------------------------------------------------------------
# Forward pass  (== Segmentor_swin_resd.forward)
# ----------------------------------------------------------------------------
def segmentor_forward(params, x, *, p=4, d1=32, d2=64, num_classes=4):
    assert num_classes <= NCLS_PAD
    B, C, H, W = x.shape
    assert H % p == 0 and W % p == 0
    Hp, Wp = H // p, W // p
    assert Hp % 2 == 0 and Wp % 2 == 0, "patch grid must be even for 2x2 merging"
    K1 = C * p * p

    tr = _pick_rows(B, Hp, Wp)
    nrb, trh, wph = Hp // tr, tr // 2, Wp // 2
    ch1, ch2 = tr * Wp, (tr // 2) * (Wp // 2)
    nblk = B * nrb
    NV, VW = _slab_dims(d1, d2)

    # Quadrant-major patchify (pure layout plumbing; bf16 before the big transpose).
    xb = x.astype(jnp.bfloat16).reshape(B, C, nrb, trh, 2, p, wph, 2, p)
    xb = xb.transpose(0, 2, 4, 7, 3, 6, 1, 5, 8)     # (b, rb, dy, dx, r2, c2, C, py, px)
    tokens = xb.reshape(nblk, ch1, K1)

    vec, cls_cm = _pack_params(params, d1, d2, num_classes)

    T1, T2 = nblk * ch1, nblk * ch2
    cost = pl.CostEstimate(
        flops=int(2 * T1 * (K1 * d1 + 4 * d1 * d1 + 2 * d1 * d1 + d1 * NCLS_PAD)
                  + 2 * T2 * (4 * d1 * d2 + 4 * d2 * d2 + d2 * d1)),
        transcendentals=int(T1 * 2 * d1 + T2 * 2 * d2),
        bytes_accessed=int(2 * T1 * K1 + 4 * T1 * NCLS_PAD + 4 * NV * VW
                           + 2 * (K1 * d1 + 4 * d1 * d1 + 4 * d1 * d2 + 8 * d2 * d2
                                  + 2 * d1 * d1 + d2 * d1)
                           + 4 * NCLS_PAD * (d1 + 1)))

    def wspec(shape):
        return pl.BlockSpec(shape, lambda i: (0, 0))

    head_out = pl.pallas_call(
        functools.partial(_segmentor_kernel, d1=d1, d2=d2, ch2=ch2),
        grid=(nblk,),
        in_specs=[
            pl.BlockSpec((1, ch1, K1), lambda i: (i, 0, 0)),   # per-block tokens
            wspec((NV, VW)),                                   # packed 1-D params slab
            wspec((K1, d1)),                                   # patch-embed W
            wspec((d1, 2 * d1)), wspec((2 * d1, d1)),          # block-1 MLP
            wspec((4 * d1, d2)),                               # patch-merge linear
            wspec((d2, 2 * d2)), wspec((2 * d2, d2)),          # block-2 MLP
            wspec((d1, d1)), wspec((d2, d1)),                  # proj1 / proj2
            wspec((d1, d1)),                                   # residual MLP
            wspec((NCLS_PAD, d1 + 1)),                         # classifier (class-major + bias col)
        ],
        out_specs=pl.BlockSpec((1, NCLS_PAD, ch1), lambda i: (i, 0, 0)),
        out_shape=jax.ShapeDtypeStruct((nblk, NCLS_PAD, ch1), jnp.float32),
        compiler_params=pltpu.CompilerParams(
            dimension_semantics=("parallel",),
            vmem_limit_bytes=32 * 1024 * 1024),
        cost_estimate=cost,
    )(tokens, vec, params["pe_w"],
      params["blk1"]["w1"], params["blk1"]["w2"],
      params["merge_w"],
      params["blk2"]["w1"], params["blk2"]["w2"],
      params["proj1_w"], params["proj2_w"], params["res_w"], cls_cm)

    # class-major, quadrant-ordered blocks -> NCHW logits [B, ncls, H/p, W/p]
    y = head_out.reshape(B, nrb, NCLS_PAD, 2, 2, trh, wph)
    y = y.transpose(0, 2, 1, 5, 3, 6, 4)             # (B, cls, rb, r2, dy, c2, dx)
    return y.reshape(B, NCLS_PAD, Hp, Wp)[:, :num_classes]


if __name__ == "__main__":
    key = jax.random.PRNGKey(0)
    k_param, k_x = jax.random.split(key)
    params = init_params(k_param, c_in=3, d1=32, d2=64, num_classes=4, p=4)
    # NCHW input like PyTorch; spatial 32 so patch(4) + 2x merge tile cleanly.
    x = jax.random.normal(k_x, (2, 3, 32, 32), jnp.float32)

    fwd = jax.jit(functools.partial(segmentor_forward, p=4, d1=32, d2=64, num_classes=4))
    y = jax.block_until_ready(fwd(params, x))
    assert y.shape == (2, 4, 8, 8), y.shape
    assert bool(jnp.all(jnp.isfinite(y)))
    print("KERNEL_OK")
</pallas_src>

<mosaic_0001>
module attributes {stable_mosaic.version = 11 : i64} {
  func.func @_segmentor_kernel(%arg0: i32, %arg1: memref<1x64x48xbf16, #tpu.memory_space<vmem>>, %arg2: memref<24x128xf32, #tpu.memory_space<vmem>>, %arg3: memref<48x32xbf16, #tpu.memory_space<vmem>>, %arg4: memref<32x64xbf16, #tpu.memory_space<vmem>>, %arg5: memref<64x32xbf16, #tpu.memory_space<vmem>>, %arg6: memref<128x64xbf16, #tpu.memory_space<vmem>>, %arg7: memref<64x128xbf16, #tpu.memory_space<vmem>>, %arg8: memref<128x64xbf16, #tpu.memory_space<vmem>>, %arg9: memref<32x32xbf16, #tpu.memory_space<vmem>>, %arg10: memref<64x32xbf16, #tpu.memory_space<vmem>>, %arg11: memref<32x32xbf16, #tpu.memory_space<vmem>>, %arg12: memref<8x33xf32, #tpu.memory_space<vmem>>, %arg13: memref<1x8x64xf32, #tpu.memory_space<vmem>>) attributes {dimension_semantics = [#tpu.dimension_semantics<parallel>], iteration_bounds = array<i64: 2>, scalar_prefetch = 0 : i64, scratch_operands = 0 : i64, tpu.core_type = #tpu.core_type<tc>, window_params = [{transform_indices = @transform_0, window_bounds = array<i64: 1, 64, 48>}, {pipeline_mode = #tpu.pipeline_mode<synchronous>, transform_indices = @transform_1, window_bounds = array<i64: 24, 128>}, {pipeline_mode = #tpu.pipeline_mode<synchronous>, transform_indices = @transform_2, window_bounds = array<i64: 48, 32>}, {pipeline_mode = #tpu.pipeline_mode<synchronous>, transform_indices = @transform_3, window_bounds = array<i64: 32, 64>}, {pipeline_mode = #tpu.pipeline_mode<synchronous>, transform_indices = @transform_4, window_bounds = array<i64: 64, 32>}, {pipeline_mode = #tpu.pipeline_mode<synchronous>, transform_indices = @transform_5, window_bounds = array<i64: 128, 64>}, {pipeline_mode = #tpu.pipeline_mode<synchronous>, transform_indices = @transform_6, window_bounds = array<i64: 64, 128>}, {pipeline_mode = #tpu.pipeline_mode<synchronous>, transform_indices = @transform_7, window_bounds = array<i64: 128, 64>}, {pipeline_mode = #tpu.pipeline_mode<synchronous>, transform_indices = @transform_8, window_bounds = array<i64: 32, 32>}, {pipeline_mode = #tpu.pipeline_mode<synchronous>, transform_indices = @transform_9, window_bounds = array<i64: 64, 32>}, {pipeline_mode = #tpu.pipeline_mode<synchronous>, transform_indices = @transform_10, window_bounds = array<i64: 32, 32>}, {pipeline_mode = #tpu.pipeline_mode<synchronous>, transform_indices = @transform_11, window_bounds = array<i64: 8, 33>}, {transform_indices = @transform_12, window_bounds = array<i64: 1, 8, 64>}]} {
    %c0 = arith.constant 0 : index
    %c0_0 = arith.constant 0 : index
    %c0_1 = arith.constant 0 : index
    %0 = vector.load %arg1[%c0, %c0_0, %c0_1] : memref<1x64x48xbf16, #tpu.memory_space<vmem>>, vector<1x64x48xbf16>
    %1 = vector.shape_cast %0 : vector<1x64x48xbf16> to vector<64x48xbf16>
    %2 = arith.extf %1 : vector<64x48xbf16> to vector<64x48xf32>
    %c0_2 = arith.constant 0 : index
    %c0_3 = arith.constant 0 : index
    %3 = vector.load %arg2[%c0_2, %c0_3] : memref<24x128xf32, #tpu.memory_space<vmem>>, vector<1x32xf32>
    %c0_4 = arith.constant 0 : index
    %c0_5 = arith.constant 0 : index
    %4 = vector.load %arg3[%c0_4, %c0_5] : memref<48x32xbf16, #tpu.memory_space<vmem>>, vector<48x32xbf16>
    %5 = arith.extf %4 : vector<48x32xbf16> to vector<48x32xf32>
    %cst = arith.constant dense<0.000000e+00> : vector<64x32xf32>
    %6 = tpu.matmul %2, %5, %cst {dimension_numbers = #tpu.dot_dimension_numbers<[1], [0], [0], [1], [0, 0, 1, 1], [], []>} : vector<64x48xf32>, vector<48x32xf32>, vector<64x32xf32> -> vector<64x32xf32>
    %7 = vector.broadcast %3 : vector<1x32xf32> to vector<64x32xf32>
    %8 = arith.addf %6, %7 : vector<64x32xf32>
    %c1 = arith.constant 1 : index
    %c0_6 = arith.constant 0 : index
    %9 = vector.load %arg2[%c1, %c0_6] : memref<24x128xf32, #tpu.memory_space<vmem>>, vector<1x32xf32>
    %c2 = arith.constant 2 : index
    %c0_7 = arith.constant 0 : index
    %10 = vector.load %arg2[%c2, %c0_7] : memref<24x128xf32, #tpu.memory_space<vmem>>, vector<1x32xf32>
    %cst_8 = arith.constant dense<0.000000e+00> : vector<64xf32>
    %11 = vector.multi_reduction <add>, %8, %cst_8 [1] : vector<64x32xf32> to vector<64xf32>
    %12 = vector.shape_cast %11 : vector<64xf32> to vector<64x1xf32>
    %cst_9 = arith.constant 3.200000e+01 : f32
    %13 = vector.broadcast %cst_9 : f32 to vector<64x1xf32>
    %14 = arith.divf %12, %13 : vector<64x1xf32>
    %15 = vector.broadcast %14 : vector<64x1xf32> to vector<64x32xf32>
    %16 = arith.subf %8, %15 : vector<64x32xf32>
    %17 = arith.mulf %16, %16 : vector<64x32xf32>
    %cst_10 = arith.constant dense<0.000000e+00> : vector<64xf32>
    %18 = vector.multi_reduction <add>, %17, %cst_10 [1] : vector<64x32xf32> to vector<64xf32>
    %19 = vector.shape_cast %18 : vector<64xf32> to vector<64x1xf32>
    %cst_11 = arith.constant 3.200000e+01 : f32
    %20 = vector.broadcast %cst_11 : f32 to vector<64x1xf32>
    %21 = arith.divf %19, %20 : vector<64x1xf32>
    %22 = vector.broadcast %14 : vector<64x1xf32> to vector<64x32xf32>
    %23 = arith.subf %8, %22 : vector<64x32xf32>
    %cst_12 = arith.constant 9.99999974E-6 : f32
    %24 = vector.broadcast %cst_12 : f32 to vector<64x1xf32>
    %25 = arith.addf %21, %24 : vector<64x1xf32>
    %26 = math.rsqrt %25 : vector<64x1xf32>
    %27 = vector.broadcast %26 : vector<64x1xf32> to vector<64x32xf32>
    %28 = arith.mulf %23, %27 : vector<64x32xf32>
    %29 = vector.broadcast %9 : vector<1x32xf32> to vector<64x32xf32>
    %30 = arith.mulf %28, %29 : vector<64x32xf32>
    %31 = vector.broadcast %10 : vector<1x32xf32> to vector<64x32xf32>
    %32 = arith.addf %30, %31 : vector<64x32xf32>
    %c3 = arith.constant 3 : index
    %c0_13 = arith.constant 0 : index
    %33 = vector.load %arg2[%c3, %c0_13] : memref<24x128xf32, #tpu.memory_space<vmem>>, vector<1x32xf32>
    %c4 = arith.constant 4 : index
    %c0_14 = arith.constant 0 : index
    %34 = vector.load %arg2[%c4, %c0_14] : memref<24x128xf32, #tpu.memory_space<vmem>>, vector<1x32xf32>
    %cst_15 = arith.constant dense<0.000000e+00> : vector<64xf32>
    %35 = vector.multi_reduction <add>, %32, %cst_15 [1] : vector<64x32xf32> to vector<64xf32>
    %36 = vector.shape_cast %35 : vector<64xf32> to vector<64x1xf32>
    %cst_16 = arith.constant 3.200000e+01 : f32
    %37 = vector.broadcast %cst_16 : f32 to vector<64x1xf32>
    %38 = arith.divf %36, %37 : vector<64x1xf32>
    %39 = vector.broadcast %38 : vector<64x1xf32> to vector<64x32xf32>
    %40 = arith.subf %32, %39 : vector<64x32xf32>
    %41 = arith.mulf %40, %40 : vector<64x32xf32>
    %cst_17 = arith.constant dense<0.000000e+00> : vector<64xf32>
    %42 = vector.multi_reduction <add>, %41, %cst_17 [1] : vector<64x32xf32> to vector<64xf32>
    %43 = vector.shape_cast %42 : vector<64xf32> to vector<64x1xf32>
    %cst_18 = arith.constant 3.200000e+01 : f32
    %44 = vector.broadcast %cst_18 : f32 to vector<64x1xf32>
    %45 = arith.divf %43, %44 : vector<64x1xf32>
    %46 = vector.broadcast %38 : vector<64x1xf32> to vector<64x32xf32>
    %47 = arith.subf %32, %46 : vector<64x32xf32>
    %cst_19 = arith.constant 9.99999974E-6 : f32
    %48 = vector.broadcast %cst_19 : f32 to vector<64x1xf32>
    %49 = arith.addf %45, %48 : vector<64x1xf32>
    %50 = math.rsqrt %49 : vector<64x1xf32>
    %51 = vector.broadcast %50 : vector<64x1xf32> to vector<64x32xf32>
    %52 = arith.mulf %47, %51 : vector<64x32xf32>
    %53 = vector.broadcast %33 : vector<1x32xf32> to vector<64x32xf32>
    %54 = arith.mulf %52, %53 : vector<64x32xf32>
    %55 = vector.broadcast %34 : vector<1x32xf32> to vector<64x32xf32>
    %56 = arith.addf %54, %55 : vector<64x32xf32>
    %c5 = arith.constant 5 : index
    %c0_20 = arith.constant 0 : index
    %57 = vector.load %arg2[%c5, %c0_20] : memref<24x128xf32, #tpu.memory_space<vmem>>, vector<1x64xf32>
    %c0_21 = arith.constant 0 : index
    %c0_22 = arith.constant 0 : index
    %58 = vector.load %arg4[%c0_21, %c0_22] : memref<32x64xbf16, #tpu.memory_space<vmem>>, vector<32x64xbf16>
    %59 = arith.extf %58 : vector<32x64xbf16> to vector<32x64xf32>
    %cst_23 = arith.constant dense<0.000000e+00> : vector<64x64xf32>
    %60 = tpu.matmul %56, %59, %cst_23 {dimension_numbers = #tpu.dot_dimension_numbers<[1], [0], [0], [1], [0, 0, 1, 1], [], []>} : vector<64x32xf32>, vector<32x64xf32>, vector<64x64xf32> -> vector<64x64xf32>
    %61 = vector.broadcast %57 : vector<1x64xf32> to vector<64x64xf32>
    %62 = arith.addf %60, %61 : vector<64x64xf32>
    %63 = arith.mulf %62, %62 : vector<64x64xf32>
    %64 = arith.mulf %62, %63 : vector<64x64xf32>
    %cst_24 = arith.constant 4.471500e-02 : f32
    %65 = vector.broadcast %cst_24 : f32 to vector<64x64xf32>
    %66 = arith.mulf %65, %64 : vector<64x64xf32>
    %67 = arith.addf %62, %66 : vector<64x64xf32>
    %cst_25 = arith.constant 0.797884583 : f32
    %68 = vector.broadcast %cst_25 : f32 to vector<64x64xf32>
    %69 = arith.mulf %68, %67 : vector<64x64xf32>
    %70 = math.tanh %69 : vector<64x64xf32>
    %cst_26 = arith.constant 1.000000e+00 : f32
    %71 = vector.broadcast %cst_26 : f32 to vector<64x64xf32>
    %72 = arith.addf %71, %70 : vector<64x64xf32>
    %cst_27 = arith.constant 5.000000e-01 : f32
    %73 = vector.broadcast %cst_27 : f32 to vector<64x64xf32>
    %74 = arith.mulf %73, %72 : vector<64x64xf32>
    %75 = arith.mulf %62, %74 : vector<64x64xf32>
    %c6 = arith.constant 6 : index
    %c0_28 = arith.constant 0 : index
    %76 = vector.load %arg2[%c6, %c0_28] : memref<24x128xf32, #tpu.memory_space<vmem>>, vector<1x32xf32>
    %c0_29 = arith.constant 0 : index
    %c0_30 = arith.constant 0 : index
    %77 = vector.load %arg5[%c0_29, %c0_30] : memref<64x32xbf16, #tpu.memory_space<vmem>>, vector<64x32xbf16>
    %78 = arith.extf %77 : vector<64x32xbf16> to vector<64x32xf32>
    %cst_31 = arith.constant dense<0.000000e+00> : vector<64x32xf32>
    %79 = tpu.matmul %75, %78, %cst_31 {dimension_numbers = #tpu.dot_dimension_numbers<[1], [0], [0], [1], [0, 0, 1, 1], [], []>} : vector<64x64xf32>, vector<64x32xf32>, vector<64x32xf32> -> vector<64x32xf32>
    %80 = vector.broadcast %76 : vector<1x32xf32> to vector<64x32xf32>
    %81 = arith.addf %79, %80 : vector<64x32xf32>
    %82 = arith.addf %32, %81 : vector<64x32xf32>
    %83 = vector.extract_strided_slice %82 {offsets = [0, 0], sizes = [16, 32], strides = [1, 1]} : vector<64x32xf32> to vector<16x32xf32>
    %84 = vector.extract_strided_slice %82 {offsets = [16, 0], sizes = [16, 32], strides = [1, 1]} : vector<64x32xf32> to vector<16x32xf32>
    %85 = vector.extract_strided_slice %82 {offsets = [32, 0], sizes = [16, 32], strides = [1, 1]} : vector<64x32xf32> to vector<16x32xf32>
    %86 = vector.extract_strided_slice %82 {offsets = [48, 0], sizes = [16, 32], strides = [1, 1]} : vector<64x32xf32> to vector<16x32xf32>
    %cst_32 = arith.constant dense<0.000000e+00> : vector<16xf32>
    %87 = vector.multi_reduction <add>, %83, %cst_32 [1] : vector<16x32xf32> to vector<16xf32>
    %88 = vector.shape_cast %87 : vector<16xf32> to vector<16x1xf32>
    %cst_33 = arith.constant 0.000000e+00 : f32
    %89 = vector.broadcast %cst_33 : f32 to vector<16x1xf32>
    %90 = arith.addf %89, %88 : vector<16x1xf32>
    %cst_34 = arith.constant dense<0.000000e+00> : vector<16xf32>
    %91 = vector.multi_reduction <add>, %84, %cst_34 [1] : vector<16x32xf32> to vector<16xf32>
    %92 = vector.shape_cast %91 : vector<16xf32> to vector<16x1xf32>
    %93 = arith.addf %90, %92 : vector<16x1xf32>
    %cst_35 = arith.constant dense<0.000000e+00> : vector<16xf32>
    %94 = vector.multi_reduction <add>, %85, %cst_35 [1] : vector<16x32xf32> to vector<16xf32>
    %95 = vector.shape_cast %94 : vector<16xf32> to vector<16x1xf32>
    %96 = arith.addf %93, %95 : vector<16x1xf32>
    %cst_36 = arith.constant dense<0.000000e+00> : vector<16xf32>
    %97 = vector.multi_reduction <add>, %86, %cst_36 [1] : vector<16x32xf32> to vector<16xf32>
    %98 = vector.shape_cast %97 : vector<16xf32> to vector<16x1xf32>
    %99 = arith.addf %96, %98 : vector<16x1xf32>
    %cst_37 = arith.constant 7.812500e-03 : f32
    %100 = vector.broadcast %cst_37 : f32 to vector<16x1xf32>
    %101 = arith.mulf %99, %100 : vector<16x1xf32>
    %102 = vector.broadcast %101 : vector<16x1xf32> to vector<16x32xf32>
    %103 = arith.subf %83, %102 : vector<16x32xf32>
    %104 = arith.mulf %103, %103 : vector<16x32xf32>
    %cst_38 = arith.constant dense<0.000000e+00> : vector<16xf32>
    %105 = vector.multi_reduction <add>, %104, %cst_38 [1] : vector<16x32xf32> to vector<16xf32>
    %106 = vector.shape_cast %105 : vector<16xf32> to vector<16x1xf32>
    %cst_39 = arith.constant 0.000000e+00 : f32
    %107 = vector.broadcast %cst_39 : f32 to vector<16x1xf32>
    %108 = arith.addf %107, %106 : vector<16x1xf32>
    %109 = vector.broadcast %101 : vector<16x1xf32> to vector<16x32xf32>
    %110 = arith.subf %84, %109 : vector<16x32xf32>
    %111 = arith.mulf %110, %110 : vector<16x32xf32>
    %cst_40 = arith.constant dense<0.000000e+00> : vector<16xf32>
    %112 = vector.multi_reduction <add>, %111, %cst_40 [1] : vector<16x32xf32> to vector<16xf32>
    %113 = vector.shape_cast %112 : vector<16xf32> to vector<16x1xf32>
    %114 = arith.addf %108, %113 : vector<16x1xf32>
    %115 = vector.broadcast %101 : vector<16x1xf32> to vector<16x32xf32>
    %116 = arith.subf %85, %115 : vector<16x32xf32>
    %117 = arith.mulf %116, %116 : vector<16x32xf32>
    %cst_41 = arith.constant dense<0.000000e+00> : vector<16xf32>
    %118 = vector.multi_reduction <add>, %117, %cst_41 [1] : vector<16x32xf32> to vector<16xf32>
    %119 = vector.shape_cast %118 : vector<16xf32> to vector<16x1xf32>
    %120 = arith.addf %114, %119 : vector<16x1xf32>
    %121 = vector.broadcast %101 : vector<16x1xf32> to vector<16x32xf32>
    %122 = arith.subf %86, %121 : vector<16x32xf32>
    %123 = arith.mulf %122, %122 : vector<16x32xf32>
    %cst_42 = arith.constant dense<0.000000e+00> : vector<16xf32>
    %124 = vector.multi_reduction <add>, %123, %cst_42 [1] : vector<16x32xf32> to vector<16xf32>
    %125 = vector.shape_cast %124 : vector<16xf32> to vector<16x1xf32>
    %126 = arith.addf %120, %125 : vector<16x1xf32>
    %cst_43 = arith.constant 7.812500e-03 : f32
    %127 = vector.broadcast %cst_43 : f32 to vector<16x1xf32>
    %128 = arith.mulf %126, %127 : vector<16x1xf32>
    %cst_44 = arith.constant 9.99999974E-6 : f32
    %129 = vector.broadcast %cst_44 : f32 to vector<16x1xf32>
    %130 = arith.addf %128, %129 : vector<16x1xf32>
    %131 = math.rsqrt %130 : vector<16x1xf32>
    %c7 = arith.constant 7 : index
    %c0_45 = arith.constant 0 : index
    %132 = vector.load %arg2[%c7, %c0_45] : memref<24x128xf32, #tpu.memory_space<vmem>>, vector<1x128xf32>
    %c8 = arith.constant 8 : index
    %c0_46 = arith.constant 0 : index
    %133 = vector.load %arg2[%c8, %c0_46] : memref<24x128xf32, #tpu.memory_space<vmem>>, vector<1x128xf32>
    %c0_47 = arith.constant 0 : index
    %c0_48 = arith.constant 0 : index
    %134 = vector.load %arg6[%c0_47, %c0_48] : memref<128x64xbf16, #tpu.memory_space<vmem>>, vector<128x64xbf16>
    %135 = arith.extf %134 : vector<128x64xbf16> to vector<128x64xf32>
    %c9 = arith.constant 9 : index
    %c0_49 = arith.constant 0 : index
    %136 = vector.load %arg2[%c9, %c0_49] : memref<24x128xf32, #tpu.memory_space<vmem>>, vector<1x64xf32>
    %137 = vector.broadcast %101 : vector<16x1xf32> to vector<16x32xf32>
    %138 = arith.subf %83, %137 : vector<16x32xf32>
    %139 = vector.broadcast %131 : vector<16x1xf32> to vector<16x32xf32>
    %140 = arith.mulf %138, %139 : vector<16x32xf32>
    %141 = vector.extract_strided_slice %132 {offsets = [0, 0], sizes = [1, 32], strides = [1, 1]} : vector<1x128xf32> to vector<1x32xf32>
    %142 = vector.broadcast %141 : vector<1x32xf32> to vector<16x32xf32>
    %143 = arith.mulf %140, %142 : vector<16x32xf32>
    %144 = vector.extract_strided_slice %133 {offsets = [0, 0], sizes = [1, 32], strides = [1, 1]} : vector<1x128xf32> to vector<1x32xf32>
    %145 = vector.broadcast %144 : vector<1x32xf32> to vector<16x32xf32>
    %146 = arith.addf %143, %145 : vector<16x32xf32>
    %147 = vector.extract_strided_slice %135 {offsets = [0, 0], sizes = [32, 64], strides = [1, 1]} : vector<128x64xf32> to vector<32x64xf32>
    %cst_50 = arith.constant dense<0.000000e+00> : vector<16x64xf32>
    %148 = tpu.matmul %146, %147, %cst_50 {dimension_numbers = #tpu.dot_dimension_numbers<[1], [0], [0], [1], [0, 0, 1, 1], [], []>} : vector<16x32xf32>, vector<32x64xf32>, vector<16x64xf32> -> vector<16x64xf32>
    %149 = vector.broadcast %136 : vector<1x64xf32> to vector<16x64xf32>
    %150 = arith.addf %149, %148 : vector<16x64xf32>
    %151 = vector.broadcast %101 : vector<16x1xf32> to vector<16x32xf32>
    %152 = arith.subf %84, %151 : vector<16x32xf32>
    %153 = vector.broadcast %131 : vector<16x1xf32> to vector<16x32xf32>
    %154 = arith.mulf %152, %153 : vector<16x32xf32>
    %155 = vector.extract_strided_slice %132 {offsets = [0, 32], sizes = [1, 32], strides = [1, 1]} : vector<1x128xf32> to vector<1x32xf32>
    %156 = vector.broadcast %155 : vector<1x32xf32> to vector<16x32xf32>
    %157 = arith.mulf %154, %156 : vector<16x32xf32>
    %158 = vector.extract_strided_slice %133 {offsets = [0, 32], sizes = [1, 32], strides = [1, 1]} : vector<1x128xf32> to vector<1x32xf32>
    %159 = vector.broadcast %158 : vector<1x32xf32> to vector<16x32xf32>
    %160 = arith.addf %157, %159 : vector<16x32xf32>
    %161 = vector.extract_strided_slice %135 {offsets = [32, 0], sizes = [32, 64], strides = [1, 1]} : vector<128x64xf32> to vector<32x64xf32>
    %cst_51 = arith.constant dense<0.000000e+00> : vector<16x64xf32>
    %162 = tpu.matmul %160, %161, %cst_51 {dimension_numbers = #tpu.dot_dimension_numbers<[1], [0], [0], [1], [0, 0, 1, 1], [], []>} : vector<16x32xf32>, vector<32x64xf32>, vector<16x64xf32> -> vector<16x64xf32>
    %163 = arith.addf %150, %162 : vector<16x64xf32>
    %164 = vector.broadcast %101 : vector<16x1xf32> to vector<16x32xf32>
    %165 = arith.subf %85, %164 : vector<16x32xf32>
    %166 = vector.broadcast %131 : vector<16x1xf32> to vector<16x32xf32>
    %167 = arith.mulf %165, %166 : vector<16x32xf32>
    %168 = vector.extract_strided_slice %132 {offsets = [0, 64], sizes = [1, 32], strides = [1, 1]} : vector<1x128xf32> to vector<1x32xf32>
    %169 = vector.broadcast %168 : vector<1x32xf32> to vector<16x32xf32>
    %170 = arith.mulf %167, %169 : vector<16x32xf32>
    %171 = vector.extract_strided_slice %133 {offsets = [0, 64], sizes = [1, 32], strides = [1, 1]} : vector<1x128xf32> to vector<1x32xf32>
    %172 = vector.broadcast %171 : vector<1x32xf32> to vector<16x32xf32>
    %173 = arith.addf %170, %172 : vector<16x32xf32>
    %174 = vector.extract_strided_slice %135 {offsets = [64, 0], sizes = [32, 64], strides = [1, 1]} : vector<128x64xf32> to vector<32x64xf32>
    %cst_52 = arith.constant dense<0.000000e+00> : vector<16x64xf32>
    %175 = tpu.matmul %173, %174, %cst_52 {dimension_numbers = #tpu.dot_dimension_numbers<[1], [0], [0], [1], [0, 0, 1, 1], [], []>} : vector<16x32xf32>, vector<32x64xf32>, vector<16x64xf32> -> vector<16x64xf32>
    %176 = arith.addf %163, %175 : vector<16x64xf32>
    %177 = vector.broadcast %101 : vector<16x1xf32> to vector<16x32xf32>
    %178 = arith.subf %86, %177 : vector<16x32xf32>
    %179 = vector.broadcast %131 : vector<16x1xf32> to vector<16x32xf32>
    %180 = arith.mulf %178, %179 : vector<16x32xf32>
    %181 = vector.extract_strided_slice %132 {offsets = [0, 96], sizes = [1, 32], strides = [1, 1]} : vector<1x128xf32> to vector<1x32xf32>
    %182 = vector.broadcast %181 : vector<1x32xf32> to vector<16x32xf32>
    %183 = arith.mulf %180, %182 : vector<16x32xf32>
    %184 = vector.extract_strided_slice %133 {offsets = [0, 96], sizes = [1, 32], strides = [1, 1]} : vector<1x128xf32> to vector<1x32xf32>
    %185 = vector.broadcast %184 : vector<1x32xf32> to vector<16x32xf32>
    %186 = arith.addf %183, %185 : vector<16x32xf32>
    %187 = vector.extract_strided_slice %135 {offsets = [96, 0], sizes = [32, 64], strides = [1, 1]} : vector<128x64xf32> to vector<32x64xf32>
    %cst_53 = arith.constant dense<0.000000e+00> : vector<16x64xf32>
    %188 = tpu.matmul %186, %187, %cst_53 {dimension_numbers = #tpu.dot_dimension_numbers<[1], [0], [0], [1], [0, 0, 1, 1], [], []>} : vector<16x32xf32>, vector<32x64xf32>, vector<16x64xf32> -> vector<16x64xf32>
    %189 = arith.addf %176, %188 : vector<16x64xf32>
    %c10 = arith.constant 10 : index
    %c0_54 = arith.constant 0 : index
    %190 = vector.load %arg2[%c10, %c0_54] : memref<24x128xf32, #tpu.memory_space<vmem>>, vector<1x64xf32>
    %c11 = arith.constant 11 : index
    %c0_55 = arith.constant 0 : index
    %191 = vector.load %arg2[%c11, %c0_55] : memref<24x128xf32, #tpu.memory_space<vmem>>, vector<1x64xf32>
    %cst_56 = arith.constant dense<0.000000e+00> : vector<16xf32>
    %192 = vector.multi_reduction <add>, %189, %cst_56 [1] : vector<16x64xf32> to vector<16xf32>
    %193 = vector.shape_cast %192 : vector<16xf32> to vector<16x1xf32>
    %cst_57 = arith.constant 6.400000e+01 : f32
    %194 = vector.broadcast %cst_57 : f32 to vector<16x1xf32>
    %195 = arith.divf %193, %194 : vector<16x1xf32>
    %196 = vector.broadcast %195 : vector<16x1xf32> to vector<16x64xf32>
    %197 = arith.subf %189, %196 : vector<16x64xf32>
    %198 = arith.mulf %197, %197 : vector<16x64xf32>
    %cst_58 = arith.constant dense<0.000000e+00> : vector<16xf32>
    %199 = vector.multi_reduction <add>, %198, %cst_58 [1] : vector<16x64xf32> to vector<16xf32>
    %200 = vector.shape_cast %199 : vector<16xf32> to vector<16x1xf32>
    %cst_59 = arith.constant 6.400000e+01 : f32
    %201 = vector.broadcast %cst_59 : f32 to vector<16x1xf32>
    %202 = arith.divf %200, %201 : vector<16x1xf32>
    %203 = vector.broadcast %195 : vector<16x1xf32> to vector<16x64xf32>
    %204 = arith.subf %189, %203 : vector<16x64xf32>
    %cst_60 = arith.constant 9.99999974E-6 : f32
    %205 = vector.broadcast %cst_60 : f32 to vector<16x1xf32>
    %206 = arith.addf %202, %205 : vector<16x1xf32>
    %207 = math.rsqrt %206 : vector<16x1xf32>
    %208 = vector.broadcast %207 : vector<16x1xf32> to vector<16x64xf32>
    %209 = arith.mulf %204, %208 : vector<16x64xf32>
    %210 = vector.broadcast %190 : vector<1x64xf32> to vector<16x64xf32>
    %211 = arith.mulf %209, %210 : vector<16x64xf32>
    %212 = vector.broadcast %191 : vector<1x64xf32> to vector<16x64xf32>
    %213 = arith.addf %211, %212 : vector<16x64xf32>
    %c12 = arith.constant 12 : index
    %c0_61 = arith.constant 0 : index
    %214 = vector.load %arg2[%c12, %c0_61] : memref<24x128xf32, #tpu.memory_space<vmem>>, vector<1x128xf32>
    %c0_62 = arith.constant 0 : index
    %c0_63 = arith.constant 0 : index
    %215 = vector.load %arg7[%c0_62, %c0_63] : memref<64x128xbf16, #tpu.memory_space<vmem>>, vector<64x128xbf16>
    %216 = arith.extf %215 : vector<64x128xbf16> to vector<64x128xf32>
    %cst_64 = arith.constant dense<0.000000e+00> : vector<16x128xf32>
    %217 = tpu.matmul %213, %216, %cst_64 {dimension_numbers = #tpu.dot_dimension_numbers<[1], [0], [0], [1], [0, 0, 1, 1], [], []>} : vector<16x64xf32>, vector<64x128xf32>, vector<16x128xf32> -> vector<16x128xf32>
    %218 = vector.broadcast %214 : vector<1x128xf32> to vector<16x128xf32>
    %219 = arith.addf %217, %218 : vector<16x128xf32>
    %220 = arith.mulf %219, %219 : vector<16x128xf32>
    %221 = arith.mulf %219, %220 : vector<16x128xf32>
    %cst_65 = arith.constant 4.471500e-02 : f32
    %222 = vector.broadcast %cst_65 : f32 to vector<16x128xf32>
    %223 = arith.mulf %222, %221 : vector<16x128xf32>
    %224 = arith.addf %219, %223 : vector<16x128xf32>
    %cst_66 = arith.constant 0.797884583 : f32
    %225 = vector.broadcast %cst_66 : f32 to vector<16x128xf32>
    %226 = arith.mulf %225, %224 : vector<16x128xf32>
    %227 = math.tanh %226 : vector<16x128xf32>
    %cst_67 = arith.constant 1.000000e+00 : f32
    %228 = vector.broadcast %cst_67 : f32 to vector<16x128xf32>
    %229 = arith.addf %228, %227 : vector<16x128xf32>
    %cst_68 = arith.constant 5.000000e-01 : f32
    %230 = vector.broadcast %cst_68 : f32 to vector<16x128xf32>
    %231 = arith.mulf %230, %229 : vector<16x128xf32>
    %232 = arith.mulf %219, %231 : vector<16x128xf32>
    %c13 = arith.constant 13 : index
    %c0_69 = arith.constant 0 : index
    %233 = vector.load %arg2[%c13, %c0_69] : memref<24x128xf32, #tpu.memory_space<vmem>>, vector<1x64xf32>
    %c0_70 = arith.constant 0 : index
    %c0_71 = arith.constant 0 : index
    %234 = vector.load %arg8[%c0_70, %c0_71] : memref<128x64xbf16, #tpu.memory_space<vmem>>, vector<128x64xbf16>
    %235 = arith.extf %234 : vector<128x64xbf16> to vector<128x64xf32>
    %cst_72 = arith.constant dense<0.000000e+00> : vector<16x64xf32>
    %236 = tpu.matmul %232, %235, %cst_72 {dimension_numbers = #tpu.dot_dimension_numbers<[1], [0], [0], [1], [0, 0, 1, 1], [], []>} : vector<16x128xf32>, vector<128x64xf32>, vector<16x64xf32> -> vector<16x64xf32>
    %237 = vector.broadcast %233 : vector<1x64xf32> to vector<16x64xf32>
    %238 = arith.addf %236, %237 : vector<16x64xf32>
    %239 = arith.addf %189, %238 : vector<16x64xf32>
    %c14 = arith.constant 14 : index
    %c0_73 = arith.constant 0 : index
    %240 = vector.load %arg2[%c14, %c0_73] : memref<24x128xf32, #tpu.memory_space<vmem>>, vector<1x32xf32>
    %c15 = arith.constant 15 : index
    %c0_74 = arith.constant 0 : index
    %241 = vector.load %arg2[%c15, %c0_74] : memref<24x128xf32, #tpu.memory_space<vmem>>, vector<1x32xf32>
    %cst_75 = arith.constant dense<0.000000e+00> : vector<64xf32>
    %242 = vector.multi_reduction <add>, %82, %cst_75 [1] : vector<64x32xf32> to vector<64xf32>
    %243 = vector.shape_cast %242 : vector<64xf32> to vector<64x1xf32>
    %cst_76 = arith.constant 3.200000e+01 : f32
    %244 = vector.broadcast %cst_76 : f32 to vector<64x1xf32>
    %245 = arith.divf %243, %244 : vector<64x1xf32>
    %246 = vector.broadcast %245 : vector<64x1xf32> to vector<64x32xf32>
    %247 = arith.subf %82, %246 : vector<64x32xf32>
    %248 = arith.mulf %247, %247 : vector<64x32xf32>
    %cst_77 = arith.constant dense<0.000000e+00> : vector<64xf32>
    %249 = vector.multi_reduction <add>, %248, %cst_77 [1] : vector<64x32xf32> to vector<64xf32>
    %250 = vector.shape_cast %249 : vector<64xf32> to vector<64x1xf32>
    %cst_78 = arith.constant 3.200000e+01 : f32
    %251 = vector.broadcast %cst_78 : f32 to vector<64x1xf32>
    %252 = arith.divf %250, %251 : vector<64x1xf32>
    %253 = vector.broadcast %245 : vector<64x1xf32> to vector<64x32xf32>
    %254 = arith.subf %82, %253 : vector<64x32xf32>
    %cst_79 = arith.constant 9.99999974E-6 : f32
    %255 = vector.broadcast %cst_79 : f32 to vector<64x1xf32>
    %256 = arith.addf %252, %255 : vector<64x1xf32>
    %257 = math.rsqrt %256 : vector<64x1xf32>
    %258 = vector.broadcast %257 : vector<64x1xf32> to vector<64x32xf32>
    %259 = arith.mulf %254, %258 : vector<64x32xf32>
    %260 = vector.broadcast %240 : vector<1x32xf32> to vector<64x32xf32>
    %261 = arith.mulf %259, %260 : vector<64x32xf32>
    %262 = vector.broadcast %241 : vector<1x32xf32> to vector<64x32xf32>
    %263 = arith.addf %261, %262 : vector<64x32xf32>
    %c18 = arith.constant 18 : index
    %c0_80 = arith.constant 0 : index
    %264 = vector.load %arg2[%c18, %c0_80] : memref<24x128xf32, #tpu.memory_space<vmem>>, vector<1x32xf32>
    %c0_81 = arith.constant 0 : index
    %c0_82 = arith.constant 0 : index
    %265 = vector.load %arg9[%c0_81, %c0_82] : memref<32x32xbf16, #tpu.memory_space<vmem>>, vector<32x32xbf16>
    %266 = arith.extf %265 : vector<32x32xbf16> to vector<32x32xf32>
    %cst_83 = arith.constant dense<0.000000e+00> : vector<64x32xf32>
    %267 = tpu.matmul %263, %266, %cst_83 {dimension_numbers = #tpu.dot_dimension_numbers<[1], [0], [0], [1], [0, 0, 1, 1], [], []>} : vector<64x32xf32>, vector<32x32xf32>, vector<64x32xf32> -> vector<64x32xf32>
    %268 = vector.broadcast %264 : vector<1x32xf32> to vector<64x32xf32>
    %269 = arith.addf %267, %268 : vector<64x32xf32>
    %c16 = arith.constant 16 : index
    %c0_84 = arith.constant 0 : index
    %270 = vector.load %arg2[%c16, %c0_84] : memref<24x128xf32, #tpu.memory_space<vmem>>, vector<1x64xf32>
    %c17 = arith.constant 17 : index
    %c0_85 = arith.constant 0 : index
    %271 = vector.load %arg2[%c17, %c0_85] : memref<24x128xf32, #tpu.memory_space<vmem>>, vector<1x64xf32>
    %cst_86 = arith.constant dense<0.000000e+00> : vector<16xf32>
    %272 = vector.multi_reduction <add>, %239, %cst_86 [1] : vector<16x64xf32> to vector<16xf32>
    %273 = vector.shape_cast %272 : vector<16xf32> to vector<16x1xf32>
    %cst_87 = arith.constant 6.400000e+01 : f32
    %274 = vector.broadcast %cst_87 : f32 to vector<16x1xf32>
    %275 = arith.divf %273, %274 : vector<16x1xf32>
    %276 = vector.broadcast %275 : vector<16x1xf32> to vector<16x64xf32>
    %277 = arith.subf %239, %276 : vector<16x64xf32>
    %278 = arith.mulf %277, %277 : vector<16x64xf32>
    %cst_88 = arith.constant dense<0.000000e+00> : vector<16xf32>
    %279 = vector.multi_reduction <add>, %278, %cst_88 [1] : vector<16x64xf32> to vector<16xf32>
    %280 = vector.shape_cast %279 : vector<16xf32> to vector<16x1xf32>
    %cst_89 = arith.constant 6.400000e+01 : f32
    %281 = vector.broadcast %cst_89 : f32 to vector<16x1xf32>
    %282 = arith.divf %280, %281 : vector<16x1xf32>
    %283 = vector.broadcast %275 : vector<16x1xf32> to vector<16x64xf32>
    %284 = arith.subf %239, %283 : vector<16x64xf32>
    %cst_90 = arith.constant 9.99999974E-6 : f32
    %285 = vector.broadcast %cst_90 : f32 to vector<16x1xf32>
    %286 = arith.addf %282, %285 : vector<16x1xf32>
    %287 = math.rsqrt %286 : vector<16x1xf32>
    %288 = vector.broadcast %287 : vector<16x1xf32> to vector<16x64xf32>
    %289 = arith.mulf %284, %288 : vector<16x64xf32>
    %290 = vector.broadcast %270 : vector<1x64xf32> to vector<16x64xf32>
    %291 = arith.mulf %289, %290 : vector<16x64xf32>
    %292 = vector.broadcast %271 : vector<1x64xf32> to vector<16x64xf32>
    %293 = arith.addf %291, %292 : vector<16x64xf32>
    %c19 = arith.constant 19 : index
    %c0_91 = arith.constant 0 : index
    %294 = vector.load %arg2[%c19, %c0_91] : memref<24x128xf32, #tpu.memory_space<vmem>>, vector<1x32xf32>
    %c0_92 = arith.constant 0 : index
    %c0_93 = arith.constant 0 : index
    %295 = vector.load %arg10[%c0_92, %c0_93] : memref<64x32xbf16, #tpu.memory_space<vmem>>, vector<64x32xbf16>
    %296 = arith.extf %295 : vector<64x32xbf16> to vector<64x32xf32>
    %cst_94 = arith.constant dense<0.000000e+00> : vector<16x32xf32>
    %297 = tpu.matmul %293, %296, %cst_94 {dimension_numbers = #tpu.dot_dimension_numbers<[1], [0], [0], [1], [0, 0, 1, 1], [], []>} : vector<16x64xf32>, vector<64x32xf32>, vector<16x32xf32> -> vector<16x32xf32>
    %298 = vector.broadcast %294 : vector<1x32xf32> to vector<16x32xf32>
    %299 = arith.addf %297, %298 : vector<16x32xf32>
    %300 = tpu.concatenate %299, %299, %299, %299 in 0 : vector<16x32xf32>, vector<16x32xf32>, vector<16x32xf32>, vector<16x32xf32> -> vector<64x32xf32>
    %301 = arith.addf %269, %300 : vector<64x32xf32>
    %c20 = arith.constant 20 : index
    %c0_95 = arith.constant 0 : index
    %302 = vector.load %arg2[%c20, %c0_95] : memref<24x128xf32, #tpu.memory_space<vmem>>, vector<1x32xf32>
    %c0_96 = arith.constant 0 : index
    %c0_97 = arith.constant 0 : index
    %303 = vector.load %arg11[%c0_96, %c0_97] : memref<32x32xbf16, #tpu.memory_space<vmem>>, vector<32x32xbf16>
    %304 = arith.extf %303 : vector<32x32xbf16> to vector<32x32xf32>
    %cst_98 = arith.constant dense<0.000000e+00> : vector<64x32xf32>
    %305 = tpu.matmul %301, %304, %cst_98 {dimension_numbers = #tpu.dot_dimension_numbers<[1], [0], [0], [1], [0, 0, 1, 1], [], []>} : vector<64x32xf32>, vector<32x32xf32>, vector<64x32xf32> -> vector<64x32xf32>
    %306 = vector.broadcast %302 : vector<1x32xf32> to vector<64x32xf32>
    %307 = arith.addf %305, %306 : vector<64x32xf32>
    %cst_99 = arith.constant 0.000000e+00 : f32
    %308 = vector.broadcast %cst_99 : f32 to vector<64x32xf32>
    %309 = arith.maximumf %307, %308 : vector<64x32xf32>
    %310 = arith.addf %301, %309 : vector<64x32xf32>
    %c0_100 = arith.constant 0 : index
    %c0_101 = arith.constant 0 : index
    %311 = vector.load %arg12[%c0_100, %c0_101] : memref<8x33xf32, #tpu.memory_space<vmem>>, vector<8x33xf32>
    %312 = vector.extract_strided_slice %311 {offsets = [0, 0], sizes = [8, 32], strides = [1, 1]} : vector<8x33xf32> to vector<8x32xf32>
    %cst_102 = arith.constant dense<0.000000e+00> : vector<8x64xf32>
    %313 = tpu.matmul %312, %310, %cst_102 {dimension_numbers = #tpu.dot_dimension_numbers<[1], [1], [0], [0], [0, 0, 1, 0], [], []>} : vector<8x32xf32>, vector<64x32xf32>, vector<8x64xf32> -> vector<8x64xf32>
    %314 = vector.extract_strided_slice %311 {offsets = [0, 32], sizes = [8, 1], strides = [1, 1]} : vector<8x33xf32> to vector<8x1xf32>
    %315 = vector.broadcast %314 : vector<8x1xf32> to vector<8x64xf32>
    %316 = arith.addf %313, %315 : vector<8x64xf32>
    %c0_103 = arith.constant 0 : index
    %c0_104 = arith.constant 0 : index
    %c0_105 = arith.constant 0 : index
    %317 = vector.load %arg13[%c0_103, %c0_104, %c0_105] : memref<1x8x64xf32, #tpu.memory_space<vmem>>, vector<1x8x64xf32>
    %318 = vector.shape_cast %317 : vector<1x8x64xf32> to vector<8x64xf32>
    %319 = vector.shape_cast %316 : vector<8x64xf32> to vector<1x8x64xf32>
    tpu.vector_store %arg13[%c0_103, %c0_104, %c0_105], %319 {strides = array<i32>} : memref<1x8x64xf32, #tpu.memory_space<vmem>>, vector<1x8x64xf32>,
    return
  }
  func.func @transform_0(%arg0: i32) -> (i32, i32, i32) {
    %c0_i32 = arith.constant 0 : i32
    %c0_i32_0 = arith.constant 0 : i32
    %c0_i32_1 = arith.constant 0 : i32
    return %arg0, %c0_i32, %c0_i32_0 : i32, i32, i32
  }
  func.func @transform_1(%arg0: i32) -> (i32, i32) {
    %c0_i32 = arith.constant 0 : i32
    %c0_i32_0 = arith.constant 0 : i32
    %c0_i32_1 = arith.constant 0 : i32
    return %c0_i32, %c0_i32_0 : i32, i32
  }
  func.func @transform_2(%arg0: i32) -> (i32, i32) {
    %c0_i32 = arith.constant 0 : i32
    %c0_i32_0 = arith.constant 0 : i32
    %c0_i32_1 = arith.constant 0 : i32
    return %c0_i32, %c0_i32_0 : i32, i32
  }
  func.func @transform_3(%arg0: i32) -> (i32, i32) {
    %c0_i32 = arith.constant 0 : i32
    %c0_i32_0 = arith.constant 0 : i32
    %c0_i32_1 = arith.constant 0 : i32
    return %c0_i32, %c0_i32_0 : i32, i32
  }
  func.func @transform_4(%arg0: i32) -> (i32, i32) {
    %c0_i32 = arith.constant 0 : i32
    %c0_i32_0 = arith.constant 0 : i32
    %c0_i32_1 = arith.constant 0 : i32
    return %c0_i32, %c0_i32_0 : i32, i32
  }
  func.func @transform_5(%arg0: i32) -> (i32, i32) {
    %c0_i32 = arith.constant 0 : i32
    %c0_i32_0 = arith.constant 0 : i32
    %c0_i32_1 = arith.constant 0 : i32
    return %c0_i32, %c0_i32_0 : i32, i32
  }
  func.func @transform_6(%arg0: i32) -> (i32, i32) {
    %c0_i32 = arith.constant 0 : i32
    %c0_i32_0 = arith.constant 0 : i32
    %c0_i32_1 = arith.constant 0 : i32
    return %c0_i32, %c0_i32_0 : i32, i32
  }
  func.func @transform_7(%arg0: i32) -> (i32, i32) {
    %c0_i32 = arith.constant 0 : i32
    %c0_i32_0 = arith.constant 0 : i32
    %c0_i32_1 = arith.constant 0 : i32
    return %c0_i32, %c0_i32_0 : i32, i32
  }
  func.func @transform_8(%arg0: i32) -> (i32, i32) {
    %c0_i32 = arith.constant 0 : i32
    %c0_i32_0 = arith.constant 0 : i32
    %c0_i32_1 = arith.constant 0 : i32
    return %c0_i32, %c0_i32_0 : i32, i32
  }
  func.func @transform_9(%arg0: i32) -> (i32, i32) {
    %c0_i32 = arith.constant 0 : i32
    %c0_i32_0 = arith.constant 0 : i32
    %c0_i32_1 = arith.constant 0 : i32
    return %c0_i32, %c0_i32_0 : i32, i32
  }
  func.func @transform_10(%arg0: i32) -> (i32, i32) {
    %c0_i32 = arith.constant 0 : i32
    %c0_i32_0 = arith.constant 0 : i32
    %c0_i32_1 = arith.constant 0 : i32
    return %c0_i32, %c0_i32_0 : i32, i32
  }
  func.func @transform_11(%arg0: i32) -> (i32, i32) {
    %c0_i32 = arith.constant 0 : i32
    %c0_i32_0 = arith.constant 0 : i32
    %c0_i32_1 = arith.constant 0 : i32
    return %c0_i32, %c0_i32_0 : i32, i32
  }
  func.func @transform_12(%arg0: i32) -> (i32, i32, i32) {
    %c0_i32 = arith.constant 0 : i32
    %c0_i32_0 = arith.constant 0 : i32
    %c0_i32_1 = arith.constant 0 : i32
    return %arg0, %c0_i32, %c0_i32_0 : i32, i32, i32
  }
}

</mosaic_0001>

<bundles_post_ra>
// kernel: segmentor_forward.1
= control target key start
LH: loop header
LB: loop body
LE: loop exit
PB: predicated region body
PF: predicated region fallthrough
CT: control target
= control target key end

     0   :  { %s3735_s21 = smov 0   ;;  %s4406_s0 = inlined_call_operand.vmem [shape: bf16[2,64,48], index: 0, kind: input, shape index: {}]   ;;  %s4407_s1 = inlined_call_operand.vmem [shape: f32[24,128], index: 1, kind: input, shape index: {}]   ;;  %s4408_s2 = inlined_call_operand.vmem [shape: bf16[48,32], index: 2, kind: input, shape index: {}]   ;;  %s4409_s3 = inlined_call_operand.vmem [shape: bf16[32,64], index: 3, kind: input, shape index: {}]   ;;  %s4410_s4 = inlined_call_operand.vmem [shape: bf16[64,32], index: 4, kind: input, shape index: {}]   ;;  %s4411_s5 = inlined_call_operand.vmem [shape: bf16[128,64], index: 5, kind: input, shape index: {}]   ;;  %s4412_s6 = inlined_call_operand.vmem [shape: bf16[64,128], index: 6, kind: input, shape index: {}]   ;;  %s4413_s7 = inlined_call_operand.vmem [shape: bf16[128,64], index: 7, kind: input, shape index: {}]   ;;  %s4414_s8 = inlined_call_operand.vmem [shape: bf16[32,32], index: 8, kind: input, shape index: {}]   ;;  %s4415_s9 = inlined_call_operand.vmem [shape: bf16[64,32], index: 9, kind: input, shape index: {}]   ;;  %s4416_s10 = inlined_call_operand.vmem [shape: bf16[32,32], index: 10, kind: input, shape index: {}]   ;;  %s4417_s11 = inlined_call_operand.vmem [shape: f32[8,33], index: 11, kind: input, shape index: {}]   ;;  %s4418_s12 = inlined_call_operand.vmem [shape: f32[2,8,64], index: 12, kind: output, shape index: {}]  }
   0x1 LB: > { %s2708_s22 = sadd.s32 4294967295, %s3661_s21   ;;  %p2712_p0 = scmp.ge.s32.totalorder %s3661_s21, 1  ;;  %s3661_s21 = sphi %s3735_s21, %s22_s21  }
   0x2   : > { %p362_p1 = scmp.lt.s32.totalorder %s3661_s21, 3 }
   0x4   : > { %p363_p2 = pnand %p2712_p0, %p362_p1 }
   0x5   : > { %v2818_v0 = vld [vmem:[%s4408_s2] sm:$0xff] (!%p363_p2)   ;;  %v2968_v1 = vld [vmem:[%s4408_s2 + $0x8] sm:$0xff] (!%p363_p2)   ;;  %p403_p3 = scmp.lt.s32.totalorder (!%p363_p2), %s2708_s22, 1  ;;  %v2969_v2 = vld [vmem:[%s4408_s2 + $0x10] sm:$0xff] (!%p363_p2)   ;;  %vm445_vm0 = vcmask (!%p363_p2), 392192   ;;  %vm577_vm1 = vcmask (!%p363_p2), 261120  }
   0x6   : > { %366 = sbr.rel (%p363_p2) target bundleno = 3686 (0xe66), region = 68  ;;  %3382 = vmatprep.subr.bf16.mxu0 (!%p363_p2), %v2818_v0  ;;  %3545 = vmatprep.subr.bf16.mxu1 (!%p363_p2), %v2818_v0  ;;  %v2716_v15 = vld [vmem:[%s4407_s1] ss:$0 sm:$0xff] (!%p363_p2)  ;;  %vm1072_vm2 = vcmask (!%p363_p2), 523264   ;;  %s3665_s15 = smov (!%p363_p2), 32   ;;  %vm3667_vm3 = vmmov (!%p363_p2), 0   ;;  %vm4385_vm4 = vmpackc.low (!%p363_p2), %vm577_vm1, %vm577_vm1 }
   0x7   : > { %3384 = vmatpush3.bf16.msra.mxu0 (!%p363_p2), %v2818_v0  ;;  %3548 = vmatpush3.bf16.msra.mxu1 (!%p363_p2), %v2818_v0 }
   0x8   : > { %3386 = vmatprep.subr.bf16.mxu0 (!%p363_p2), %v2968_v1  ;;  %3546 = vmatprep.subr.bf16.mxu1 (!%p363_p2), %v2968_v1 }
   0xb   : > { %3388 = vmatpush3.bf16.msra.mxu0 (!%p363_p2), %v2968_v1  ;;  %3549 = vmatpush3.bf16.msra.mxu1 (!%p363_p2), %v2968_v1 }
   0xc   : > { %3390 = vmatprep.subr.bf16.mxu0 (!%p363_p2), %v2969_v2  ;;  %3547 = vmatprep.subr.bf16.mxu1 (!%p363_p2), %v2969_v2 }
   0xd   : > { %s4422_s22 = smov (!%p403_p3, %s2708_s22), 1 }
   0xe   : > { %s2800_s29 = sshll.u32 %s4422_s22, 5  ;;  %s2715_s18 = sshll.u32 %s4422_s22, 3 }
   0xf   : > { %s407_s14 = scalar_lea.vmem %s4406_s0, %s2800_s29  ;;  %3392 = vmatpush3.bf16.msra.mxu0 %v2969_v2  ;;  %3550 = vmatpush3.bf16.msra.mxu1 %v2969_v2  ;;  %s3663_s29 = smov 96  }
  0x10   : > { %v2802_v3 = vld [vmem:[%s407_s14] sm:$0xff]   ;;  %v2966_v4 = vld [vmem:[%s407_s14 + $0x10] sm:$0xff]   ;;  %v2965_v6 = vld [vmem:[%s407_s14 + $0x8] sm:$0xff]   ;;  %s411_s23 = scalar_lea.vmem %s4418_s12, %s2715_s18 }
  0x11   : > { %v2803_v5 = vunpack.c.l.bf16 %v2802_v3  ;;  %v2967_v7 = vld [vmem:[%s407_s14 + $0x18] sm:$0xff]   ;;  %v2811_v8 = vunpack.c.l.bf16 %v2966_v4  ;;  %v2804_v9 = vunpack.c.h.bf16 %v2802_v3  ;;  %v2812_v10 = vunpack.c.h.bf16 %v2966_v4  ;;  %s3664_s14 = smov 64  }
  0x12   : > { %v2807_v11 = vunpack.c.l.bf16 %v2965_v6  ;;  %v2815_v12 = vunpack.c.l.bf16 %v2967_v7  ;;  %v2808_v13 = vunpack.c.h.bf16 %v2965_v6  ;;  %v2816_v14 = vunpack.c.h.bf16 %v2967_v7 }
  0x13   : > { %3145 = vmatprep.mubr.msk.f32.mxu0 %vm445_vm0, %v2803_v5  ;;  %3151 = vmatprep.mubr.msk.f32.mxu1 %vm445_vm0, %v2811_v8 }
  0x14   : > { %3146 = vmatmul.mubr.msk.f32.vlgmr.msra.gmra.mrb[0].mxu0 %vm445_vm0, %v2804_v9  ;;  %3152 = vmatmul.mubr.msk.f32.vlgmr.msra.gmra.mrb[0].mxu1 %vm445_vm0, %v2812_v10 }
  0x15   : > { %3148 = vmatprep.mubr.msk.f32.mxu0 %vm445_vm0, %v2807_v11  ;;  %3154 = vmatprep.mubr.msk.f32.mxu1 %vm445_vm0, %v2815_v12 }
  0x18   : > { %3149 = vmatmul.mubr.msk.f32.gmra.mrb[2].mxu0 %vm445_vm0, %v2808_v13  ;;  %3155 = vmatmul.mubr.msk.f32.gmra.mrb[2].mxu1 %vm445_vm0, %v2816_v14 }
  0xe7   : > { %v3147_v16 = vpop.f32.mrb[0].mxu0  ;;  %v3153_v17 = vpop.f32.mrb[0].mxu1 }
  0xe8   : > { %v536_v18 = vpop.f32.mrb[1].mxu0  ;;  %v556_v19 = vpop.f32.mrb[1].mxu1  ;;  %v542_v21 = vadd.f32 %v3147_v16, %v2716_v15  ;;  %v562_v32 = vadd.f32 %v3153_v17, %v2716_v15 }
  0xe9   : > { %v537_v20 = vadd.f32 %v2716_v15, %v536_v18  ;;  %v557_v28 = vadd.f32 %v2716_v15, %v556_v19 }
  0xea   : > { %v581_v31 = vsel %vm577_vm1, %v542_v21, 0.0  ;;  %v593_v37 = vsel %vm577_vm1, %v562_v32, 0.0 }
  0xeb   : > { %v3150_v22 = vpop.f32.mrb[2].mxu0  ;;  %v578_v23 = vsel %vm577_vm1, %v537_v20, 0.0  ;;  %v3156_v24 = vpop.f32.mrb[2].mxu1  ;;  %v590_v34 = vsel %vm577_vm1, %v557_v28, 0.0 }
  0xec   : > { %v546_v25 = vpop.f32.mrb[3].mxu0  ;;  %579 = vadd.xlane.f32.xlu0 %v578_v23  ;;  %v566_v26 = vpop.f32.mrb[3].mxu1  ;;  %v552_v29 = vadd.f32 %v3150_v22, %v2716_v15  ;;  %v572_v36 = vadd.f32 %v3156_v24, %v2716_v15 }
  0xed   : > { %v547_v27 = vadd.f32 %v2716_v15, %v546_v25  ;;  %v567_v33 = vadd.f32 %v2716_v15, %v566_v26 }
  0xee   : > { %v587_v35 = vsel %vm577_vm1, %v552_v29, 0.0  ;;  %v599_v39 = vsel %vm577_vm1, %v572_v36, 0.0 }
  0xef   : > { %v584_v30 = vsel %vm577_vm1, %v547_v27, 0.0  ;;  %v596_v38 = vsel %vm577_vm1, %v567_v33, 0.0 }
  0xf0   : > { %585 = vadd.xlane.f32.xlu1 %v584_v30  ;;  %582 = vadd.xlane.f32.xlu0 %v581_v31 }
  0xf4   : > { %588 = vadd.xlane.f32.xlu1 %v587_v35  ;;  %591 = vadd.xlane.f32.xlu0 %v590_v34 }
  0xf8   : > { %594 = vadd.xlane.f32.xlu1 %v593_v37  ;;  %597 = vadd.xlane.f32.xlu0 %v596_v38  ;;  %v2725_v38 = vld [vmem:[%s4407_s1 + $0x1] ss:$0 sm:$0xff] }
  0xfc   : > { %600 = vadd.xlane.f32.xlu1 %v599_v39 }
 0x179   : > { %v580_v40 = vpop.xlane.xlu0 %579 }
 0x17a   : > { %v603_v41 = vmul.f32 0.03125, %v580_v40 }
 0x17c   : > { %v3777_v42 = vsub.f32 %v537_v20, %v603_v41 }
 0x17d   : > { %v586_v43 = vpop.xlane.xlu1 %585  ;;  %v583_v44 = vpop.xlane.xlu0 %582 }
 0x17e   : > { %v605_v45 = vmul.f32 0.03125, %v586_v43  ;;  %v604_v46 = vmul.f32 0.03125, %v583_v44  ;;  %v619_v47 = vmul.f32 %v3777_v42, %v3777_v42  ;;  %v2726_v43 = vld [vmem:[%s4407_s1 + $0x2] ss:$0 sm:$0xff] }
 0x180   : > { %v3781_v48 = vsub.f32 %v547_v27, %v605_v45  ;;  %v3783_v49 = vsub.f32 %v542_v21, %v604_v46  ;;  %v627_v50 = vsel %vm577_vm1, %v619_v47, 0.0 }
 0x181   : > { %v589_v51 = vpop.xlane.xlu1 %588  ;;  %628 = vadd.xlane.f32.xlu0 %v627_v50  ;;  %v592_v52 = vpop.xlane.xlu0 %591 }
 0x182   : > { %v606_v53 = vmul.f32 0.03125, %v589_v51  ;;  %v607_v54 = vmul.f32 0.03125, %v592_v52  ;;  %v621_v55 = vmul.f32 %v3781_v48, %v3781_v48  ;;  %v620_v56 = vmul.f32 %v3783_v49, %v3783_v49 }
 0x184   : > { %v3790_v57 = vsub.f32 %v552_v29, %v606_v53  ;;  %v3792_v58 = vsub.f32 %v557_v28, %v607_v54  ;;  %v633_v59 = vsel %vm577_vm1, %v621_v55, 0.0  ;;  %v630_v60 = vsel %vm577_vm1, %v620_v56, 0.0 }
 0x185   : > { %v595_v61 = vpop.xlane.xlu1 %594  ;;  %634 = vadd.xlane.f32.xlu0 %v633_v59  ;;  %631 = vadd.xlane.f32.xlu1 %v630_v60  ;;  %v598_v62 = vpop.xlane.xlu0 %597 }
 0x186   : > { %v608_v63 = vmul.f32 0.03125, %v595_v61  ;;  %v609_v0 = vmul.f32 0.03125, %v598_v62  ;;  %v622_v1 = vmul.f32 %v3790_v57, %v3790_v57  ;;  %v623_v2 = vmul.f32 %v3792_v58, %v3792_v58 }
 0x188   : > { %v3800_v3 = vsub.f32 %v562_v32, %v608_v63  ;;  %v3802_v4 = vsub.f32 %v567_v33, %v609_v0  ;;  %v636_v5 = vsel %vm577_vm1, %v622_v1, 0.0  ;;  %v639_v6 = vsel %vm577_vm1, %v623_v2, 0.0 }
 0x189   : > { %v601_v7 = vpop.xlane.xlu1 %600  ;;  %637 = vadd.xlane.f32.xlu1 %v636_v5  ;;  %640 = vadd.xlane.f32.xlu0 %v639_v6 }
 0x18a   : > { %v610_v8 = vmul.f32 0.03125, %v601_v7  ;;  %v624_v9 = vmul.f32 %v3800_v3, %v3800_v3  ;;  %v625_v10 = vmul.f32 %v3802_v4, %v3802_v4 }
 0x18c   : > { %v3810_v11 = vsub.f32 %v572_v36, %v610_v8  ;;  %v642_v12 = vsel %vm577_vm1, %v624_v9, 0.0  ;;  %v645_v13 = vsel %vm577_vm1, %v625_v10, 0.0 }
 0x18d   : > { %643 = vadd.xlane.f32.xlu1 %v642_v12  ;;  %646 = vadd.xlane.f32.xlu0 %v645_v13 }
 0x18e   : > { %v626_v14 = vmul.f32 %v3810_v11, %v3810_v11 }
 0x190   : > { %v648_v15 = vsel %vm577_vm1, %v626_v14, 0.0 }
 0x191   : > { %649 = vadd.xlane.f32.xlu1 %v648_v15 }
 0x20e   : > { %v629_v16 = vpop.xlane.xlu0 %628 }
 0x20f   : > { %v651_v17 = vmul.f32 0.03125, %v629_v16 }
 0x211   : > { %v659_v18 = vadd.f32 1e-05, %v651_v17 }
 0x212   : > { %v632_v19 = vpop.xlane.xlu1 %631  ;;  %v635_v20 = vpop.xlane.xlu0 %634 }
 0x213   : > { %3575 = vrsqrt.f32 %v659_v18  ;;  %v652_v21 = vmul.f32 0.03125, %v632_v19  ;;  %v653_v22 = vmul.f32 0.03125, %v635_v20 }
 0x215   : > { %v660_v23 = vadd.f32 1e-05, %v652_v21  ;;  %v661_v24 = vadd.f32 1e-05, %v653_v22 }
 0x216   : > { %v638_v25 = vpop.xlane.xlu1 %637  ;;  %v641_v26 = vpop.xlane.xlu0 %640 }
 0x217   : > { %3577 = vrsqrt.f32 %v660_v23  ;;  %v654_v27 = vmul.f32 0.03125, %v638_v25  ;;  %v655_v28 = vmul.f32 0.03125, %v641_v26 }
 0x218   : > { %3579 = vrsqrt.f32 %v661_v24 }
 0x219   : > { %v662_v29 = vadd.f32 1e-05, %v654_v27  ;;  %v663_v30 = vadd.f32 1e-05, %v655_v28 }
 0x21a   : > { %v644_v31 = vpop.xlane.xlu1 %643  ;;  %v647_v32 = vpop.xlane.xlu0 %646 }
 0x21b   : > { %3581 = vrsqrt.f32 %v662_v29  ;;  %v656_v33 = vmul.f32 0.03125, %v644_v31  ;;  %v657_v34 = vmul.f32 0.03125, %v647_v32 }
 0x21c   : > { %3583 = vrsqrt.f32 %v663_v30 }
 0x21d   : > { %v3576_v35 = vpop.eup %3575  ;;  %v664_v36 = vadd.f32 1e-05, %v656_v33  ;;  %v665_v37 = vadd.f32 1e-05, %v657_v34 }
 0x21e   : > { %v650_v39 = vpop.xlane.xlu1 %649  ;;  %v675_v40 = vmul.f32 %v3576_v35, %v3777_v42 }
 0x21f   : > { %3585 = vrsqrt.f32 %v664_v36  ;;  %v658_v41 = vmul.f32 0.03125, %v650_v39 }
 0x220   : > { %3587 = vrsqrt.f32 %v665_v37  ;;  %v687_v44 = vmul.f32 %v2725_v38, %v675_v40 }
 0x221   : > { %v3578_v45 = vpop.eup %3577  ;;  %v666_v46 = vadd.f32 1e-05, %v658_v41 }
 0x222   : > { %v3580_v47 = vpop.eup %3579  ;;  %v3824_v50 = vadd.f32 %v2726_v43, %v687_v44  ;;  %v676_v51 = vmul.f32 %v3578_v45, %v3783_v49 }
 0x223   : > { %3589 = vrsqrt.f32 %v666_v46  ;;  %v677_v52 = vmul.f32 %v3580_v47, %v3781_v48 }
 0x224   : > { %v709_v42 = vsel %vm577_vm1, %v3824_v50, 0.0  ;;  %v688_v53 = vmul.f32 %v2725_v38, %v676_v51 }
 0x225   : > { %v3582_v54 = vpop.eup %3581  ;;  %710 = vadd.xlane.f32.xlu0 %v709_v42  ;;  %v689_v55 = vmul.f32 %v2725_v38, %v677_v52 }
 0x226   : > { %v3584_v56 = vpop.eup %3583  ;;  %v3830_v59 = vadd.f32 %v2726_v43, %v688_v53  ;;  %v678_v60 = vmul.f32 %v3582_v54, %v3790_v57 }
 0x227   : > { %v3833_v61 = vadd.f32 %v2726_v43, %v689_v55  ;;  %v679_v62 = vmul.f32 %v3584_v56, %v3792_v58 }
 0x228   : > { %v712_v49 = vsel %vm577_vm1, %v3830_v59, 0.0  ;;  %v690_v48 = vmul.f32 %v2725_v38, %v678_v60 }
 0x229   : > { %v3586_v63 = vpop.eup %3585  ;;  %713 = vadd.xlane.f32.xlu1 %v712_v49  ;;  %v715_v0 = vsel %vm577_vm1, %v3833_v61, 0.0  ;;  %v691_v1 = vmul.f32 %v2725_v38, %v679_v62 }
 0x22a   : > { %v3588_v2 = vpop.eup %3587  ;;  %716 = vadd.xlane.f32.xlu0 %v715_v0  ;;  %v3840_v5 = vadd.f32 %v2726_v43, %v690_v48  ;;  %v680_v57 = vmul.f32 %v3586_v63, %v3800_v3  ;;  %v2830_v63 = vld [vmem:[%s4409_s3] sm:$0xff]   ;;  %v2970_v0 = vld [vmem:[%s4409_s3 + $0x8] sm:$0xff]  }
 0x22b   : > { %v3843_v6 = vadd.f32 %v2726_v43, %v691_v1  ;;  %v681_v58 = vmul.f32 %v3588_v2, %v3802_v4  ;;  %3394 = vmatprep.subr.bf16.mxu1 %v2830_v63 }
 0x22c   : > { %v718_v7 = vsel %vm577_vm1, %v3840_v5, 0.0  ;;  %v692_v8 = vmul.f32 %v2725_v38, %v680_v57  ;;  %3396 = vmatpush3.bf16.msra.mxu1 %v2830_v63 }
 0x22d   : > { %v3590_v9 = vpop.eup %3589  ;;  %719 = vadd.xlane.f32.xlu1 %v718_v7  ;;  %v721_v10 = vsel %vm577_vm1, %v3843_v6, 0.0  ;;  %v693_v12 = vmul.f32 %v2725_v38, %v681_v58  ;;  %3398 = vmatprep.subr.bf16.mxu1 %v2970_v0 }
 0x22e   : > { %722 = vadd.xlane.f32.xlu0 %v721_v10  ;;  %v3850_v13 = vadd.f32 %v2726_v43, %v692_v8  ;;  %v682_v14 = vmul.f32 %v3590_v9, %v3810_v11 }
 0x22f   : > { %v3853_v3 = vadd.f32 %v2726_v43, %v693_v12 }
 0x230   : > { %v724_v4 = vsel %vm577_vm1, %v3850_v13, 0.0  ;;  %v694_v15 = vmul.f32 %v2725_v38, %v682_v14  ;;  %3400 = vmatpush3.bf16.msra.mxu1 %v2970_v0 }
 0x231   : > { %725 = vadd.xlane.f32.xlu1 %v724_v4  ;;  %v727_v16 = vsel %vm577_vm1, %v3853_v3, 0.0 }
 0x232   : > { %728 = vadd.xlane.f32.xlu0 %v727_v16  ;;  %v3859_v17 = vadd.f32 %v2726_v43, %v694_v15 }
 0x234   : > { %v730_v18 = vsel %vm577_vm1, %v3859_v17, 0.0 }
 0x235   : > { %731 = vadd.xlane.f32.xlu1 %v730_v18 }
 0x2b2   : > { %v711_v19 = vpop.xlane.xlu0 %710 }
 0x2b3   : > { %v733_v20 = vmul.f32 0.03125, %v711_v19 }
 0x2b5   : > { %v3864_v11 = vsub.f32 %v3824_v50, %v733_v20 }
 0x2b6   : > { %v714_v21 = vpop.xlane.xlu1 %713 }
 0x2b7   : > { %v734_v22 = vmul.f32 0.03125, %v714_v21  ;;  %v717_v23 = vpop.xlane.xlu0 %716  ;;  %v749_v24 = vmul.f32 %v3864_v11, %v3864_v11 }
 0x2b8   : > { %v735_v25 = vmul.f32 0.03125, %v717_v23 }
 0x2b9   : > { %v3869_v26 = vsub.f32 %v3830_v59, %v734_v22  ;;  %v757_v27 = vsel %vm577_vm1, %v749_v24, 0.0 }
 0x2ba   : > { %v3873_v28 = vsub.f32 %v3833_v61, %v735_v25  ;;  %v720_v29 = vpop.xlane.xlu1 %719  ;;  %758 = vadd.xlane.f32.xlu0 %v757_v27  ;;  %v2727_v25 = vld [vmem:[%s4407_s1 + $0x3] ss:$0 sm:$0xff] }
 0x2bb   : > { %v736_v30 = vmul.f32 0.03125, %v720_v29  ;;  %v723_v31 = vpop.xlane.xlu0 %722  ;;  %v750_v32 = vmul.f32 %v3869_v26, %v3869_v26 }
 0x2bc   : > { %v737_v33 = vmul.f32 0.03125, %v723_v31  ;;  %v751_v34 = vmul.f32 %v3873_v28, %v3873_v28 }
 0x2bd   : > { %v3880_v35 = vsub.f32 %v3840_v5, %v736_v30  ;;  %v760_v36 = vsel %vm577_vm1, %v750_v32, 0.0  ;;  %v2728_v32 = vld [vmem:[%s4407_s1 + $0x4] ss:$0 sm:$0xff] }
 0x2be   : > { %v3884_v37 = vsub.f32 %v3843_v6, %v737_v33  ;;  %761 = vadd.xlane.f32.xlu1 %v760_v36  ;;  %v726_v38 = vpop.xlane.xlu1 %725  ;;  %v763_v39 = vsel %vm577_vm1, %v751_v34, 0.0 }
 0x2bf   : > { %v738_v40 = vmul.f32 0.03125, %v726_v38  ;;  %764 = vadd.xlane.f32.xlu0 %v763_v39  ;;  %v729_v41 = vpop.xlane.xlu0 %728  ;;  %v752_v43 = vmul.f32 %v3880_v35, %v3880_v35 }
 0x2c0   : > { %v739_v44 = vmul.f32 0.03125, %v729_v41  ;;  %v753_v45 = vmul.f32 %v3884_v37, %v3884_v37 }
 0x2c1   : > { %v3892_v46 = vsub.f32 %v3850_v13, %v738_v40  ;;  %v766_v47 = vsel %vm577_vm1, %v752_v43, 0.0 }
 0x2c2   : > { %v3896_v51 = vsub.f32 %v3853_v3, %v739_v44  ;;  %767 = vadd.xlane.f32.xlu1 %v766_v47  ;;  %v732_v52 = vpop.xlane.xlu1 %731  ;;  %v769_v42 = vsel %vm577_vm1, %v753_v45, 0.0 }
 0x2c3   : > { %v740_v53 = vmul.f32 0.03125, %v732_v52  ;;  %770 = vadd.xlane.f32.xlu0 %v769_v42  ;;  %v754_v54 = vmul.f32 %v3892_v46, %v3892_v46 }
 0x2c4   : > { %v755_v55 = vmul.f32 %v3896_v51, %v3896_v51 }
 0x2c5   : > { %v3904_v56 = vsub.f32 %v3859_v17, %v740_v53  ;;  %v772_v60 = vsel %vm577_vm1, %v754_v54, 0.0 }
 0x2c6   : > { %773 = vadd.xlane.f32.xlu1 %v772_v60  ;;  %v775_v62 = vsel %vm577_vm1, %v755_v55, 0.0 }
 0x2c7   : > { %776 = vadd.xlane.f32.xlu0 %v775_v62  ;;  %v756_v49 = vmul.f32 %v3904_v56, %v3904_v56 }
 0x2c9   : > { %v778_v48 = vsel %vm577_vm1, %v756_v49, 0.0 }
 0x2ca   : > { %779 = vadd.xlane.f32.xlu1 %v778_v48 }
 0x347   : > { %v759_v1 = vpop.xlane.xlu0 %758 }
 0x348   : > { %v781_v2 = vmul.f32 0.03125, %v759_v1 }
 0x34a   : > { %v789_v57 = vadd.f32 1e-05, %v781_v2 }
 0x34b   : > { %v762_v58 = vpop.xlane.xlu1 %761 }
 0x34c   : > { %3591 = vrsqrt.f32 %v789_v57  ;;  %v782_v7 = vmul.f32 0.03125, %v762_v58  ;;  %v765_v8 = vpop.xlane.xlu0 %764 }
 0x34d   : > { %v783_v9 = vmul.f32 0.03125, %v765_v8  ;;  %v2973_v8 = vld [vmem:[%s4410_s4 + $0x18] sm:$0xff]  }
 0x34e   : > { %v790_v10 = vadd.f32 1e-05, %v782_v7  ;;  %v2971_v7 = vld [vmem:[%s4410_s4 + $0x8] sm:$0xff]  }
 0x34f   : > { %v791_v12 = vadd.f32 1e-05, %v783_v9  ;;  %v768_v14 = vpop.xlane.xlu1 %767  ;;  %v2729_v9 = vld [vmem:[%s4407_s1 + $0x5] ss:$0 sm:$0xff] }
 0x350   : > { %3593 = vrsqrt.f32 %v790_v10  ;;  %v784_v4 = vmul.f32 0.03125, %v768_v14  ;;  %v771_v15 = vpop.xlane.xlu0 %770 }
 0x351   : > { %3595 = vrsqrt.f32 %v791_v12  ;;  %v785_v16 = vmul.f32 0.03125, %v771_v15 }
 0x352   : > { %v792_v18 = vadd.f32 1e-05, %v784_v4 }
 0x353   : > { %v793_v19 = vadd.f32 1e-05, %v785_v16  ;;  %v774_v20 = vpop.xlane.xlu1 %773 }
 0x354   : > { %3597 = vrsqrt.f32 %v792_v18  ;;  %v786_v21 = vmul.f32 0.03125, %v774_v20  ;;  %v777_v22 = vpop.xlane.xlu0 %776 }
 0x355   : > { %3599 = vrsqrt.f32 %v793_v19  ;;  %v787_v23 = vmul.f32 0.03125, %v777_v22 }
 0x356   : > { %v3592_v24 = vpop.eup %3591  ;;  %v794_v27 = vadd.f32 1e-05, %v786_v21 }
 0x357   : > { %v795_v29 = vadd.f32 1e-05, %v787_v23  ;;  %v780_v30 = vpop.xlane.xlu1 %779  ;;  %v805_v31 = vmul.f32 %v3592_v24, %v3864_v11 }
 0x358   : > { %3601 = vrsqrt.f32 %v794_v27  ;;  %v788_v33 = vmul.f32 0.03125, %v780_v30 }
 0x359   : > { %3603 = vrsqrt.f32 %v795_v29  ;;  %v817_v34 = vmul.f32 %v2727_v25, %v805_v31 }
 0x35a   : > { %v3594_v36 = vpop.eup %3593  ;;  %v796_v38 = vadd.f32 1e-05, %v788_v33 }
 0x35b   : > { %v3596_v39 = vpop.eup %3595  ;;  %v806_v40 = vmul.f32 %v3594_v36, %v3869_v26  ;;  %v829_v41 = vadd.f32 %v2728_v32, %v817_v34 }
 0x35c   : > { %3605 = vrsqrt.f32 %v796_v38  ;;  %v807_v43 = vmul.f32 %v3596_v39, %v3873_v28 }
 0x35d   : > { %v818_v44 = vmul.f32 %v2727_v25, %v806_v40  ;;  %3165 = vmatprep.mubr.msk.f32.mxu1 %vm577_vm1, %v829_v41 }
 0x35e   : > { %v3598_v11 = vpop.eup %3597  ;;  %v819_v45 = vmul.f32 %v2727_v25, %v807_v43 }
 0x35f   : > { %v3600_v47 = vpop.eup %3599  ;;  %v830_v52 = vadd.f32 %v2728_v32, %v818_v44  ;;  %v808_v42 = vmul.f32 %v3598_v11, %v3880_v35 }
 0x360   : > { %v831_v53 = vadd.f32 %v2728_v32, %v819_v45  ;;  %v809_v54 = vmul.f32 %v3600_v47, %v3884_v37 }
 0x361   : > { %3166 = vmatmul.mubr.msk.f32.vlgmr.msra.gmra.mrb[4].mxu1 %vm577_vm1, %v830_v52  ;;  %v820_v55 = vmul.f32 %v2727_v25, %v808_v42 }
 0x362   : > { %v3602_v26 = vpop.eup %3601  ;;  %3168 = vmatprep.mubr.msk.f32.mxu1 %vm577_vm1, %v831_v53  ;;  %v821_v60 = vmul.f32 %v2727_v25, %v809_v54 }
 0x363   : > { %v3604_v28 = vpop.eup %3603  ;;  %v832_v62 = vadd.f32 %v2728_v32, %v820_v55  ;;  %v810_v49 = vmul.f32 %v3602_v26, %v3892_v46 }
 0x364   : > { %v833_v48 = vadd.f32 %v2728_v32, %v821_v60  ;;  %v811_v63 = vmul.f32 %v3604_v28, %v3896_v51  ;;  %v2838_v51 = vld [vmem:[%s4410_s4] sm:$0xff]  }
 0x365   : > { %3169 = vmatmul.mubr.msk.f32.gmra.mrb[6].mxu1 %vm577_vm1, %v832_v62  ;;  %v822_v35 = vmul.f32 %v2727_v25, %v810_v49  ;;  %3402 = vmatprep.subr.bf16.mxu1 %v2838_v51 }
 0x366   : > { %v3606_v0 = vpop.eup %3605  ;;  %3171 = vmatprep.mubr.msk.f32.mxu1 %vm577_vm1, %v833_v48  ;;  %v823_v37 = vmul.f32 %v2727_v25, %v811_v63  ;;  %3404 = vmatpush3.bf16.msra.mxu1 %v2838_v51 }
 0x367   : > { %v834_v1 = vadd.f32 %v2728_v32, %v822_v35  ;;  %v812_v2 = vmul.f32 %v3606_v0, %v3904_v56  ;;  %3406 = vmatprep.subr.bf16.mxu1 %v2971_v7  ;;  %v2972_v56 = vld [vmem:[%s4410_s4 + $0x10] sm:$0xff]  }
 0x368   : > { %v835_v57 = vadd.f32 %v2728_v32, %v823_v37 }
 0x369   : > { %3172 = vmatmul.mubr.msk.f32.gmra.mrb[8].mxu1 %vm577_vm1, %v834_v1  ;;  %v824_v58 = vmul.f32 %v2727_v25, %v812_v2 }
 0x36a   : > { %3174 = vmatprep.mubr.msk.f32.mxu1 %vm577_vm1, %v835_v57  ;;  %3408 = vmatpush3.bf16.msra.mxu1 %v2971_v7 }
 0x36b   : > { %v836_v46 = vadd.f32 %v2728_v32, %v824_v58  ;;  %3410 = vmatprep.subr.bf16.mxu1 %v2972_v56 }
 0x36d   : > { %3175 = vmatmul.mubr.msk.f32.gmra.mrb[10].mxu1 %vm577_vm1, %v836_v46 }
 0x36e   : > { %3412 = vmatpush3.bf16.msra.mxu1 %v2972_v56 }
 0x36f   : > { %3414 = vmatprep.subr.bf16.mxu1 %v2973_v8 }
 0x372   : > { %3416 = vmatpush3.bf16.msra.mxu1 %v2973_v8 }
 0x434   : > { %v3167_v10 = vpop.f32.mrb[4].mxu1 }
 0x435   : > { %v3954_v12 = vadd.f32 %v3167_v10, %v2729_v9  ;;  %v940_v14 = vpop.f32.mrb[5].mxu1 }
 0x436   : > { %v3956_v4 = vadd.f32 %v2729_v9, %v940_v14 }
 0x437   : > { %v980_v15 = vmul.f32 %v3954_v12, %v3954_v12 }
 0x438   : > { %v979_v16 = vmul.f32 %v3956_v4, %v3956_v4  ;;  %v3170_v18 = vpop.f32.mrb[6].mxu1 }
 0x439   : > { %v988_v19 = vmul.f32 %v980_v15, %v3954_v12  ;;  %v3963_v20 = vadd.f32 %v3170_v18, %v2729_v9  ;;  %v950_v21 = vpop.f32.mrb[7].mxu1 }
 0x43a   : > { %v987_v22 = vmul.f32 %v979_v16, %v3956_v4  ;;  %v3966_v23 = vadd.f32 %v2729_v9, %v950_v21 }
 0x43b   : > { %v996_v24 = vmul.f32 0.044715, %v988_v19  ;;  %v982_v25 = vmul.f32 %v3963_v20, %v3963_v20 }
 0x43c   : > { %v995_v27 = vmul.f32 0.044715, %v987_v22  ;;  %v981_v29 = vmul.f32 %v3966_v23, %v3966_v23  ;;  %v3173_v30 = vpop.f32.mrb[8].mxu1 }
 0x43d   : > { %v1004_v31 = vadd.f32 %v996_v24, %v3954_v12  ;;  %v990_v32 = vmul.f32 %v982_v25, %v3963_v20  ;;  %v3974_v33 = vadd.f32 %v3173_v30, %v2729_v9  ;;  %v960_v34 = vpop.f32.mrb[9].mxu1 }
 0x43e   : > { %v1003_v36 = vadd.f32 %v995_v27, %v3956_v4  ;;  %v989_v38 = vmul.f32 %v981_v29, %v3966_v23  ;;  %v3978_v39 = vadd.f32 %v2729_v9, %v960_v34 }
 0x43f   : > { %v1012_v40 = vmul.f32 0.7978846, %v1004_v31  ;;  %v998_v41 = vmul.f32 0.044715, %v990_v32  ;;  %v984_v43 = vmul.f32 %v3974_v33, %v3974_v33 }
 0x440   : > { %v1011_v44 = vmul.f32 0.7978846, %v1003_v36  ;;  %v997_v11 = vmul.f32 0.044715, %v989_v38  ;;  %v983_v45 = vmul.f32 %v3978_v39, %v3978_v39  ;;  %v3176_v47 = vpop.f32.mrb[10].mxu1 }
 0x441   : > { %3607 = vtanh.f32 %v1012_v40  ;;  %v1006_v52 = vadd.f32 %v998_v41, %v3963_v20  ;;  %v992_v42 = vmul.f32 %v984_v43, %v3974_v33  ;;  %v3986_v53 = vadd.f32 %v3176_v47, %v2729_v9  ;;  %v970_v54 = vpop.f32.mrb[11].mxu1 }
 0x442   : > { %3609 = vtanh.f32 %v1011_v44  ;;  %v1005_v55 = vadd.f32 %v997_v11, %v3966_v23  ;;  %v991_v26 = vmul.f32 %v983_v45, %v3978_v39  ;;  %v971_v60 = vadd.f32 %v2729_v9, %v970_v54 }
 0x443   : > { %v1014_v28 = vmul.f32 0.7978846, %v1006_v52  ;;  %v1000_v62 = vmul.f32 0.044715, %v992_v42  ;;  %v986_v49 = vmul.f32 %v3986_v53, %v3986_v53 }
 0x444   : > { %v1013_v48 = vmul.f32 0.7978846, %v1005_v55  ;;  %v999_v63 = vmul.f32 0.044715, %v991_v26  ;;  %v985_v35 = vmul.f32 %v971_v60, %v971_v60 }
 0x445   : > { %3611 = vtanh.f32 %v1014_v28  ;;  %v1008_v0 = vadd.f32 %v1000_v62, %v3974_v33  ;;  %v994_v37 = vmul.f32 %v986_v49, %v3986_v53 }
 0x446   : > { %3613 = vtanh.f32 %v1013_v48  ;;  %v1007_v1 = vadd.f32 %v999_v63, %v3978_v39  ;;  %v993_v2 = vmul.f32 %v985_v35, %v971_v60 }
 0x447   : > { %v1016_v57 = vmul.f32 0.7978846, %v1008_v0  ;;  %v1002_v58 = vmul.f32 0.044715, %v994_v37 }
 0x448   : > { %v1015_v46 = vmul.f32 0.7978846, %v1007_v1  ;;  %v1001_v51 = vmul.f32 0.044715, %v993_v2 }
 0x449   : > { %3615 = vtanh.f32 %v1016_v57  ;;  %v1010_v7 = vadd.f32 %v1002_v58, %v3986_v53 }
 0x44a   : > { %3617 = vtanh.f32 %v1015_v46  ;;  %v1009_v56 = vadd.f32 %v1001_v51, %v971_v60 }
 0x44b   : > { %v3608_v8 = vpop.eup %3607  ;;  %v1018_v9 = vmul.f32 0.7978846, %v1010_v7 }
 0x44c   : > { %v3610_v10 = vpop.eup %3609  ;;  %v1028_v14 = vadd.f32 1.0, %v3608_v8  ;;  %v1017_v15 = vmul.f32 0.7978846, %v1009_v56 }
 0x44d   : > { %3619 = vtanh.f32 %v1018_v9  ;;  %v1027_v16 = vadd.f32 1.0, %v3610_v10 }
 0x44e   : > { %v1036_v18 = vmul.f32 0.5, %v1028_v14  ;;  %3621 = vtanh.f32 %v1017_v15 }
 0x44f   : > { %v3612_v19 = vpop.eup %3611  ;;  %v1035_v21 = vmul.f32 0.5, %v1027_v16 }
 0x450   : > { %v3614_v22 = vpop.eup %3613  ;;  %v1030_v24 = vadd.f32 1.0, %v3612_v19  ;;  %v1044_v29 = vmul.f32 %v1036_v18, %v3954_v12 }
 0x451   : > { %v1043_v25 = vmul.f32 %v1035_v21, %v3956_v4  ;;  %v1029_v27 = vadd.f32 1.0, %v3614_v22 }
 0x452   : > { %v1038_v30 = vmul.f32 0.5, %v1030_v24 }
 0x453   : > { %v3616_v31 = vpop.eup %3615  ;;  %3193 = vmatprep.mubr.msk.f32.mxu1 %vm1072_vm2, %v1043_v25  ;;  %v1037_v32 = vmul.f32 0.5, %v1029_v27 }
 0x454   : > { %v3618_v34 = vpop.eup %3617  ;;  %3194 = vmatmul.mubr.msk.f32.vlgmr.msra.gmra.mrb[12].mxu1 %vm1072_vm2, %v1044_v29  ;;  %v1032_v36 = vadd.f32 1.0, %v3616_v31  ;;  %v1046_v41 = vmul.f32 %v1038_v30, %v3963_v20 }
 0x455   : > { %v1045_v38 = vmul.f32 %v1037_v32, %v3966_v23  ;;  %v1031_v40 = vadd.f32 1.0, %v3618_v34 }
 0x456   : > { %v1040_v43 = vmul.f32 0.5, %v1032_v36 }
 0x457   : > { %v3620_v44 = vpop.eup %3619  ;;  %3196 = vmatprep.mubr.msk.f32.mxu1 %vm1072_vm2, %v1045_v38  ;;  %v1039_v4 = vmul.f32 0.5, %v1031_v40 }
 0x458   : > { %v3622_v12 = vpop.eup %3621  ;;  %3197 = vmatmul.mubr.msk.f32.gmra.mrb[14].mxu1 %vm1072_vm2, %v1046_v41  ;;  %v1034_v11 = vadd.f32 1.0, %v3620_v44  ;;  %v1048_v52 = vmul.f32 %v1040_v43, %v3974_v33 }
 0x459   : > { %v1047_v45 = vmul.f32 %v1039_v4, %v3978_v39  ;;  %v1033_v47 = vadd.f32 1.0, %v3622_v12  ;;  %v2738_v39 = vld [vmem:[%s4407_s1 + $0x6] ss:$0 sm:$0xff] }
 0x45a   : > { %v1042_v42 = vmul.f32 0.5, %v1034_v11 }
 0x45b   : > { %3199 = vmatprep.mubr.msk.f32.mxu1 %vm1072_vm2, %v1047_v45  ;;  %v1041_v23 = vmul.f32 0.5, %v1033_v47 }
 0x45c   : > { %3200 = vmatmul.mubr.msk.f32.gmra.mrb[16].mxu1 %vm1072_vm2, %v1048_v52  ;;  %v1050_v54 = vmul.f32 %v1042_v42, %v3986_v53 }
 0x45d   : > { %v1049_v20 = vmul.f32 %v1041_v23, %v971_v60 }
 0x45f   : > { %3202 = vmatprep.mubr.msk.f32.mxu1 %vm1072_vm2, %v1049_v20 }
 0x460   : > { %3203 = vmatmul.mubr.msk.f32.gmra.mrb[18].mxu1 %vm1072_vm2, %v1050_v54 }
 0x527   : > { %v3195_v55 = vpop.f32.mrb[12].mxu1 }
 0x528   : > { %v1169_v26 = vadd.f32 %v3195_v55, %v2738_v39  ;;  %v1163_v33 = vpop.f32.mrb[13].mxu1 }
 0x529   : > { %v1164_v28 = vadd.f32 %v2738_v39, %v1163_v33 }
 0x52a   : > { %v4015_v62 = vadd.f32 %v1169_v26, %v3830_v59 }
 0x52b   : > { %v3198_v49 = vpop.f32.mrb[14].mxu1  ;;  %v4018_v60 = vadd.f32 %v1164_v28, %v3824_v50 }
 0x52c   : > { %v1179_v53 = vadd.f32 %v3198_v49, %v2738_v39  ;;  %v1173_v48 = vpop.f32.mrb[15].mxu1  ;;  %v1213_v63 = vsel %vm577_vm1, %v4015_v62, 0.0 }
 0x52d   : > { %v1174_v35 = vadd.f32 %v2738_v39, %v1173_v48  ;;  %1214 = vadd.xlane.f32.xlu0 %v1213_v63  ;;  %v1210_v57 = vsel %vm577_vm1, %v4018_v60, 0.0 }
 0x52e   : > { %v4023_v0 = vadd.f32 %v1179_v53, %v3840_v5 }
 0x52f   : > { %v3201_v37 = vpop.f32.mrb[16].mxu1  ;;  %v4026_v1 = vadd.f32 %v1174_v35, %v3833_v61  ;;  %v2748_v35 = vld [vmem:[%s4407_s1 + $0x8] ss:$0 sm:$0xff] }
 0x530   : > { %v1189_v59 = vadd.f32 %v3201_v37, %v2738_v39  ;;  %v1183_v2 = vpop.f32.mrb[17].mxu1  ;;  %v1221_v50 = vsel %vm577_vm1, %v4023_v0, 0.0  ;;  %v2747_v37 = vld [vmem:[%s4407_s1 + $0x7] ss:$0 sm:$0xff] }
 0x531   : > { %v1184_v58 = vadd.f32 %v2738_v39, %v1183_v2  ;;  %1222 = vadd.xlane.f32.xlu1 %v1221_v50  ;;  %1211 = vadd.xlane.f32.xlu0 %v1210_v57  ;;  %v1218_v56 = vsel %vm577_vm1, %v4026_v1, 0.0  ;;  %v2974_v2 = vld [vmem:[%s4411_s5 + $0x8] sm:$0xff]   ;;  %v2975_v50 = vld [vmem:[%s4411_s5 + $0x10] sm:$0xff]  }
 0x532   : > { %v4036_v51 = vadd.f32 %v1189_v59, %v3850_v13  ;;  %v2854_v59 = vld [vmem:[%s4411_s5] sm:$0xff]  }
 0x533   : > { %v4033_v46 = vadd.f32 %v1184_v58, %v3843_v6  ;;  %v3204_v5 = vpop.f32.mrb[18].mxu1  ;;  %3418 = vmatprep.subr.bf16.mxu0 %v2854_v59 }
 0x534   : > { %v1199_v61 = vadd.f32 %v3204_v5, %v2738_v39  ;;  %v1193_v7 = vpop.f32.mrb[19].mxu1  ;;  %v1229_v13 = vsel %vm577_vm1, %v4036_v51, 0.0  ;;  %3420 = vmatpush3.bf16.msra.mxu0 %v2854_v59 }
 0x535   : > { %v1194_v8 = vadd.f32 %v2738_v39, %v1193_v7  ;;  %1219 = vadd.xlane.f32.xlu1 %v1218_v56  ;;  %v1226_v9 = vsel %vm577_vm1, %v4033_v46, 0.0  ;;  %3422 = vmatprep.subr.bf16.mxu0 %v2974_v2 }
 0x536   : > { %1227 = vadd.xlane.f32.xlu0 %v1226_v9  ;;  %v4046_v6 = vadd.f32 %v1199_v61, %v3859_v17 }
 0x537   : > { %v4043_v10 = vadd.f32 %v1194_v8, %v3853_v3 }
 0x538   : > { %v1237_v15 = vsel %vm577_vm1, %v4046_v6, 0.0  ;;  %3424 = vmatpush3.bf16.msra.mxu0 %v2974_v2  ;;  %v2978_v2 = vld [vmem:[%s4411_s5 + $0x28] sm:$0xff]  }
 0x539   : > { %1230 = vadd.xlane.f32.xlu1 %v1229_v13  ;;  %v1234_v14 = vsel %vm577_vm1, %v4043_v10, 0.0  ;;  %3426 = vmatprep.subr.bf16.mxu0 %v2975_v50 }
 0x53a   : > { %1235 = vadd.xlane.f32.xlu0 %v1234_v14 }
 0x53d   : > { %1238 = vadd.xlane.f32.xlu1 %v1237_v15 }
 0x5ba   : > { %v4054_v16 = vpop.xlane.xlu0 %1214 }
 0x5be   : > { %v4056_v18 = vpop.xlane.xlu1 %1222  ;;  %v4058_v3 = vpop.xlane.xlu0 %1211 }
 0x5bf   : > { %v1225_v25 = vadd.f32 %v4056_v18, %v4054_v16 }
 0x5c2   : > { %v4060_v17 = vpop.xlane.xlu1 %1219 }
 0x5c3   : > { %v1224_v19 = vadd.f32 %v4060_v17, %v4058_v3  ;;  %v4064_v21 = vpop.xlane.xlu0 %1227 }
 0x5c5   : > { %v1232_v22 = vadd.f32 %v4064_v21, %v1224_v19 }
 0x5c6   : > { %v4067_v24 = vpop.xlane.xlu1 %1230 }
 0x5c7   : > { %v4071_v27 = vpop.xlane.xlu0 %1235  ;;  %v1233_v30 = vadd.f32 %v4067_v24, %v1225_v25 }
 0x5c8   : > { %v1240_v29 = vadd.f32 %v4071_v27, %v1232_v22 }
 0x5ca   : > { %v1242_v31 = vmul.f32 0.0078125, %v1240_v29  ;;  %v4075_v32 = vpop.xlane.xlu1 %1238 }
 0x5cb   : > { %v1241_v34 = vadd.f32 %v4075_v32, %v1233_v30 }
 0x5cc   : > { %v4079_v38 = vsub.f32 %v4026_v1, %v1242_v31  ;;  %v4088_v43 = vsub.f32 %v4018_v60, %v1242_v31  ;;  %v4097_v11 = vsub.f32 %v4033_v46, %v1242_v31  ;;  %v4109_v20 = vsub.f32 %v4043_v10, %v1242_v31 }
 0x5cd   : > { %v1243_v36 = vmul.f32 0.0078125, %v1241_v34 }
 0x5ce   : > { %v1258_v12 = vmul.f32 %v4079_v38, %v4079_v38  ;;  %v1246_v52 = vmul.f32 %v4088_v43, %v4088_v43  ;;  %v1270_v23 = vmul.f32 %v4097_v11, %v4097_v11  ;;  %v1282_v53 = vmul.f32 %v4109_v20, %v4109_v20 }
 0x5cf   : > { %v4082_v40 = vsub.f32 %v4023_v0, %v1243_v36  ;;  %v4085_v41 = vsub.f32 %v4015_v62, %v1243_v36  ;;  %v4104_v42 = vsub.f32 %v4036_v51, %v1243_v36  ;;  %v4116_v26 = vsub.f32 %v4046_v6, %v1243_v36 }
 0x5d0   : > { %v1260_v54 = vsel %vm577_vm1, %v1258_v12, 0.0  ;;  %v1248_v39 = vsel %vm577_vm1, %v1246_v52, 0.0  ;;  %v1272_v28 = vsel %vm577_vm1, %v1270_v23, 0.0  ;;  %v1284_v63 = vsel %vm577_vm1, %v1282_v53, 0.0 }
 0x5d1   : > { %v1259_v44 = vmul.f32 %v4082_v40, %v4082_v40  ;;  %v1247_v4 = vmul.f32 %v4085_v41, %v4085_v41  ;;  %v1271_v55 = vmul.f32 %v4104_v42, %v4104_v42  ;;  %v1283_v49 = vmul.f32 %v4116_v26, %v4116_v26 }
 0x5d3   : > { %v1263_v45 = vsel %vm577_vm1, %v1259_v44, 0.0  ;;  %v1251_v47 = vsel %vm577_vm1, %v1247_v4, 0.0  ;;  %v1275_v33 = vsel %vm577_vm1, %v1271_v55, 0.0  ;;  %v1287_v48 = vsel %vm577_vm1, %v1283_v49, 0.0 }
 0x5d4   : > { %1264 = vadd.xlane.f32.xlu1 %v1263_v45  ;;  %1252 = vadd.xlane.f32.xlu0 %v1251_v47 }
 0x5d8   : > { %1261 = vadd.xlane.f32.xlu1 %v1260_v54  ;;  %1249 = vadd.xlane.f32.xlu0 %v1248_v39 }
 0x5dc   : > { %1276 = vadd.xlane.f32.xlu1 %v1275_v33  ;;  %1273 = vadd.xlane.f32.xlu0 %v1272_v28 }
 0x5e0   : > { %1288 = vadd.xlane.f32.xlu1 %v1287_v48  ;;  %1285 = vadd.xlane.f32.xlu0 %v1284_v63 }
 0x5f1   : > { %1443 = vrot.lane.b32.xlu1 %v2748_v35, %s3663_s29 }
 0x5f5   : > { %1533 = vrot.lane.b32.xlu1 %v2747_v37, %s3664_s14 }
 0x5f6   : > { %1437 = vrot.lane.b32.xlu0 %v2747_v37, %s3663_s29 }
 0x5f9   : > { %1538 = vrot.lane.b32.xlu1 %v2748_v35, %s3664_s14 }
 0x5fa   : > { %1628 = vrot.lane.b32.xlu0 %v2747_v37, %s3665_s15 }
 0x5fd   : > { %1633 = vrot.lane.b32.xlu1 %v2748_v35, %s3665_s15 }
 0x661   : > { %v1265_v57 = vpop.xlane.xlu1 %1264  ;;  %v1253_v58 = vpop.xlane.xlu0 %1252 }
 0x662   : > { %v1267_v8 = vadd.f32 %v1265_v57, %v1253_v58 }
 0x665   : > { %v1262_v5 = vpop.xlane.xlu1 %1261  ;;  %v1250_v61 = vpop.xlane.xlu0 %1249 }
 0x666   : > { %v1266_v9 = vadd.f32 %v1262_v5, %v1250_v61 }
 0x669   : > { %v1277_v7 = vpop.xlane.xlu1 %1276  ;;  %v1274_v56 = vpop.xlane.xlu0 %1273 }
 0x66a   : > { %v1279_v13 = vadd.f32 %v1277_v7, %v1267_v8  ;;  %v1278_v14 = vadd.f32 %v1274_v56, %v1266_v9  ;;  %v2980_v56 = vld [vmem:[%s4411_s5 + $0x38] sm:$0xff]  }
 0x66d   : > { %v1289_v15 = vpop.xlane.xlu1 %1288  ;;  %v1286_v19 = vpop.xlane.xlu0 %1285 }
 0x66e   : > { %v1291_v22 = vadd.f32 %v1289_v15, %v1279_v13  ;;  %v1290_v25 = vadd.f32 %v1286_v19, %v1278_v14 }
 0x670   : > { %v1293_v29 = vmul.f32 0.0078125, %v1291_v22  ;;  %v1292_v30 = vmul.f32 0.0078125, %v1290_v25 }
 0x671   : > { %v1444_v47 = vpop.permute.xlu1 %1443  ;;  %v1438_v52 = vpop.permute.xlu0 %1437 }
 0x672   : > { %v1295_v31 = vadd.f32 1e-05, %v1293_v29  ;;  %v1294_v34 = vadd.f32 1e-05, %v1292_v30 }
 0x674   : > { %3623 = vrsqrt.f32 %v1295_v31 }
 0x675   : > { %3625 = vrsqrt.f32 %v1294_v34 }
 0x67e   : > { %v3624_v36 = vpop.eup %3623 }
 0x67f   : > { %v3626_v44 = vpop.eup %3625  ;;  %v1334_v4 = vmul.f32 %v3624_v36, %v4085_v41  ;;  %v1435_v28 = vmul.f32 %v3624_v36, %v4082_v40  ;;  %v1534_v41 = vpop.permute.xlu1 %1533  ;;  %v2977_v40 = vld [vmem:[%s4411_s5 + $0x20] sm:$0xff]   ;;  %v1627_v61 = vmul.f32 %v3624_v36, %v4116_v26  ;;  %v2751_v26 = vld [vmem:[%s4407_s1 + $0x9] ss:$0 sm:$0xff] }
 0x680   : > { %v1434_v12 = vmul.f32 %v3626_v44, %v4079_v38  ;;  %v1333_v45 = vmul.f32 %v3626_v44, %v4088_v43  ;;  %v1531_v49 = vmul.f32 %v3626_v44, %v4097_v11  ;;  %v2976_v38 = vld [vmem:[%s4411_s5 + $0x18] sm:$0xff]   ;;  %v1532_v11 = vmul.f32 %v3624_v36, %v4104_v42  ;;  %v2979_v42 = vld [vmem:[%s4411_s5 + $0x30] sm:$0xff]  }
 0x681   : > { %v1340_v23 = vmul.f32 %v2747_v37, %v1334_v4  ;;  %v1441_v43 = vmul.f32 %v1438_v52, %v1435_v28  ;;  %v1626_v59 = vmul.f32 %v3626_v44, %v4109_v20 }
 0x682   : > { %v1440_v54 = vmul.f32 %v1438_v52, %v1434_v12  ;;  %v1339_v39 = vmul.f32 %v2747_v37, %v1333_v45  ;;  %v1536_v48 = vmul.f32 %v1534_v41, %v1531_v49  ;;  %v1537_v57 = vmul.f32 %v1534_v41, %v1532_v11  ;;  %v2886_v52 = vld [vmem:[%s4412_s6] sm:$0xff]  }
 0x683   : > { %v1346_v55 = vadd.f32 %v2748_v35, %v1340_v23  ;;  %v1447_v63 = vadd.f32 %v1444_v47, %v1441_v43  ;;  %3450 = vmatprep.subr.bf16.mxu1 %v2886_v52  ;;  %v2981_v23 = vld [vmem:[%s4412_s6 + $0x8] sm:$0xff]  }
 0x684   : > { %v1345_v33 = vadd.f32 %v2748_v35, %v1339_v39  ;;  %v1446_v53 = vadd.f32 %v1444_v47, %v1440_v54  ;;  %v1539_v35 = vpop.permute.xlu1 %1538  ;;  %3452 = vmatpush3.bf16.msra.mxu1 %v2886_v52  ;;  %v2982_v54 = vld [vmem:[%s4412_s6 + $0x10] sm:$0xff]   ;;  %v2983_v39 = vld [vmem:[%s4412_s6 + $0x18] sm:$0xff]   ;;  %v2758_v43 = vld [vmem:[%s4407_s1 + $0xa] ss:$0 sm:$0xff] }
 0x685   : > { %v1541_v37 = vadd.f32 %v1539_v35, %v1536_v48  ;;  %v1542_v20 = vadd.f32 %v1539_v35, %v1537_v57  ;;  %3454 = vmatprep.subr.bf16.mxu1 %v2981_v23  ;;  %v2984_v57 = vld [vmem:[%s4413_s7 + $0x8] sm:$0xff]  }
 0x686   : > { %3213 = vmatprep.mubr.msk.f32.mxu0 %vm577_vm1, %v1345_v33 }
 0x687   : > { %3214 = vmatmul.mubr.msk.f32.vlgmr.msra.gmra.mrb[4].mxu0 %vm577_vm1, %v1346_v55 }
 0x688   : > { %3428 = vmatpush3.bf16.msra.mxu0 %v2975_v50  ;;  %3224 = vmatprep.mubr.msk.f32.mxu0 %vm577_vm1, %v1446_v53  ;;  %v1629_v50 = vpop.permute.xlu0 %1628  ;;  %v1634_v5 = vpop.permute.xlu1 %1633 }
 0x689   : > { %3430 = vmatprep.subr.bf16.mxu0 %v2976_v38  ;;  %v1631_v58 = vmul.f32 %v1629_v50, %v1626_v59  ;;  %v1632_v8 = vmul.f32 %v1629_v50, %v1627_v61  ;;  %3456 = vmatpush3.bf16.msra.mxu1 %v2981_v23  ;;  %v2902_v50 = vld [vmem:[%s4413_s7] sm:$0xff]   ;;  %v2989_v61 = vld [vmem:[%s4413_s7 + $0x30] sm:$0xff]  }
 0x68a   : > { %3458 = vmatprep.subr.bf16.mxu1 %v2982_v54 }
 0x68b   : > { %v1636_v7 = vadd.f32 %v1634_v5, %v1631_v58  ;;  %v1637_v9 = vadd.f32 %v1634_v5, %v1632_v8  ;;  %v2985_v58 = vld [vmem:[%s4413_s7 + $0x10] sm:$0xff]   ;;  %v2987_v5 = vld [vmem:[%s4413_s7 + $0x20] sm:$0xff]  }
 0x68c   : > { %3432 = vmatpush3.bf16.msra.mxu0 %v2976_v38 }
 0x68d   : > { %3434 = vmatprep.subr.bf16.mxu0 %v2977_v40  ;;  %3460 = vmatpush3.bf16.msra.mxu1 %v2982_v54 }
 0x68e   : > { %3462 = vmatprep.subr.bf16.mxu1 %v2983_v39 }
 0x68f   : > { %3225 = vmatmul.mubr.msk.f32.vlgmr.msra.gmra.mrb[4].mxu0 %vm577_vm1, %v1447_v63 }
 0x690   : > { %3436 = vmatpush3.bf16.msra.mxu0 %v2977_v40  ;;  %3235 = vmatprep.mubr.msk.f32.mxu0 %vm577_vm1, %v1541_v37  ;;  %v2759_v40 = vld [vmem:[%s4407_s1 + $0xb] ss:$0 sm:$0xff] }
 0x691   : > { %3438 = vmatprep.subr.bf16.mxu0 %v2978_v2  ;;  %3464 = vmatpush3.bf16.msra.mxu1 %v2983_v39 }
 0x692   : > { %3466 = vmatprep.subr.bf16.mxu1 %v2902_v50 }
 0x694   : > { %3440 = vmatpush3.bf16.msra.mxu0 %v2978_v2 }
 0x695   : > { %3442 = vmatprep.subr.bf16.mxu0 %v2979_v42 }
 0x697   : > { %3236 = vmatmul.mubr.msk.f32.vlgmr.msra.gmra.mrb[4].mxu0 %vm577_vm1, %v1542_v20  ;;  %v2988_v20 = vld [vmem:[%s4413_s7 + $0x28] sm:$0xff]  }
 0x698   : > { %3444 = vmatpush3.bf16.msra.mxu0 %v2979_v42  ;;  %3246 = vmatprep.mubr.msk.f32.mxu0 %vm577_vm1, %v1636_v7  ;;  %v2986_v42 = vld [vmem:[%s4413_s7 + $0x18] sm:$0xff]  }
 0x699   : > { %3446 = vmatprep.subr.bf16.mxu0 %v2980_v56  ;;  %v2990_v7 = vld [vmem:[%s4413_s7 + $0x38] sm:$0xff]  }
 0x69c   : > { %3448 = vmatpush3.bf16.msra.mxu0 %v2980_v56  ;;  %v2760_v56 = vld [vmem:[%s4407_s1 + $0xc] ss:$0 sm:$0xff] }
 0x69f   : > { %3247 = vmatmul.mubr.msk.f32.vlgmr.msra.gmra.mrb[4].mxu0 %vm577_vm1, %v1637_v9 }
 0x772   : > { %v3248_v13 = vpop.f32.mrb[4].mxu0 }
 0x773   : > { %v4175_v14 = vadd.f32 %v3248_v13, %v2751_v26  ;;  %v1710_v15 = vpop.f32.mrb[5].mxu0 }
 0x774   : > { %v4177_v19 = vadd.f32 %v2751_v26, %v1710_v15 }
 0x775   : > { %v1726_v22 = vsel %vm1072_vm2, %v4175_v14, 0.0 }
 0x776   : > { %1727 = vadd.xlane.f32.xlu1 %v1726_v22  ;;  %v1723_v25 = vsel %vm1072_vm2, %v4177_v19, 0.0 }
 0x777   : > { %1724 = vadd.xlane.f32.xlu0 %v1723_v25 }
 0x803   : > { %v1728_v29 = vpop.xlane.xlu1 %1727 }
 0x804   : > { %v1731_v30 = vmul.f32 0.015625, %v1728_v29  ;;  %v1725_v31 = vpop.xlane.xlu0 %1724 }
 0x805   : > { %v1730_v34 = vmul.f32 0.015625, %v1725_v31 }
 0x806   : > { %v1733_v36 = vsub.f32 %v4175_v14, %v1731_v30 }
 0x807   : > { %v1732_v44 = vsub.f32 %v4177_v19, %v1730_v34 }
 0x808   : > { %v1735_v45 = vmul.f32 %v1733_v36, %v1733_v36 }
 0x809   : > { %v1734_v4 = vmul.f32 %v1732_v44, %v1732_v44 }
 0x80a   : > { %v1739_v47 = vsel %vm1072_vm2, %v1735_v45, 0.0 }
 0x80b   : > { %v1736_v12 = vsel %vm1072_vm2, %v1734_v4, 0.0 }
 0x80c   : > { %1737 = vadd.xlane.f32.xlu0 %v1736_v12 }
 0x810   : > { %1740 = vadd.xlane.f32.xlu0 %v1739_v47 }
 0x899   : > { %v1738_v55 = vpop.xlane.xlu0 %1737 }
 0x89a   : > { %v1742_v33 = vmul.f32 0.015625, %v1738_v55 }
 0x89c   : > { %v1744_v28 = vadd.f32 1e-05, %v1742_v33  ;;  %v1999_v33 = vmul.f32 0.03125, %v4054_v16 }
 0x89d   : > { %v1741_v49 = vpop.xlane.xlu0 %1740 }
 0x89e   : > { %3627 = vrsqrt.f32 %v1744_v28  ;;  %v1743_v53 = vmul.f32 0.015625, %v1741_v49  ;;  %v1998_v28 = vmul.f32 0.03125, %v4058_v3  ;;  %v2763_v49 = vld [vmem:[%s4407_s1 + $0xd] ss:$0 sm:$0xff] }
 0x8a0   : > { %v1745_v38 = vadd.f32 1e-05, %v1743_v53 }
 0x8a2   : > { %3629 = vrsqrt.f32 %v1745_v38  ;;  %v4240_v38 = vsub.f32 %v4015_v62, %v1999_v33  ;;  %v2003_v62 = vmul.f32 0.03125, %v4067_v24  ;;  %v2005_v24 = vmul.f32 0.03125, %v4075_v32 }
 0x8a8   : > { %v3628_v41 = vpop.eup %3627 }
 0x8a9   : > { %v1748_v48 = vmul.f32 %v3628_v41, %v1732_v44  ;;  %v2001_v41 = vmul.f32 0.03125, %v4056_v18  ;;  %v2015_v18 = vmul.f32 %v4240_v38, %v4240_v38 }
 0x8ab   : > { %v1754_v11 = vmul.f32 %v2758_v43, %v1748_v48 }
 0x8ac   : > { %v3630_v63 = vpop.eup %3629 }
 0x8ad   : > { %v1749_v35 = vmul.f32 %v3630_v63, %v1733_v36  ;;  %v1760_v37 = vadd.f32 %v2759_v40, %v1754_v11  ;;  %v2000_v11 = vmul.f32 0.03125, %v4060_v17  ;;  %v2002_v17 = vmul.f32 0.03125, %v4064_v21 }
 0x8ae   : > { %v2004_v21 = vmul.f32 0.03125, %v4071_v27 }
 0x8af   : > { %v1755_v59 = vmul.f32 %v2758_v43, %v1749_v35  ;;  %3265 = vmatprep.mubr.msk.f32.mxu1 %vm1072_vm2, %v1760_v37  ;;  %v4250_v35 = vsub.f32 %v4023_v0, %v2001_v41  ;;  %v4264_v0 = vsub.f32 %v4036_v51, %v2003_v62  ;;  %v4278_v51 = vsub.f32 %v4046_v6, %v2005_v24 }
 0x8b1   : > { %v1761_v2 = vadd.f32 %v2759_v40, %v1755_v59  ;;  %v4244_v40 = vsub.f32 %v4018_v60, %v1998_v28  ;;  %v4257_v60 = vsub.f32 %v4026_v1, %v2000_v11  ;;  %v2025_v59 = vsel %vm577_vm1, %v2015_v18, 0.0  ;;  %v2764_v18 = vld [vmem:[%s4407_s1 + $0xe] ss:$0 sm:$0xff] }
 0x8b2   : > { %v2017_v1 = vmul.f32 %v4250_v35, %v4250_v35  ;;  %v2021_v6 = vmul.f32 %v4278_v51, %v4278_v51 }
 0x8b3   : > { %3266 = vmatmul.mubr.msk.f32.vlgmr.msra.gmra.mrb[20].mxu1 %vm1072_vm2, %v1761_v2  ;;  %v4271_v2 = vsub.f32 %v4033_v46, %v2002_v17  ;;  %v4284_v46 = vsub.f32 %v4043_v10, %v2004_v21 }
 0x8b4   : > { %3468 = vmatpush3.bf16.msra.mxu1 %v2902_v50  ;;  %v2031_v32 = vsel %vm577_vm1, %v2017_v1, 0.0  ;;  %v2043_v10 = vsel %vm577_vm1, %v2021_v6, 0.0 }
 0x8b5   : > { %3470 = vmatprep.subr.bf16.mxu1 %v2984_v57 }
 0x8b8   : > { %3472 = vmatpush3.bf16.msra.mxu1 %v2984_v57  ;;  %v2016_v57 = vmul.f32 %v4257_v60, %v4257_v60 }
 0x8b9   : > { %3474 = vmatprep.subr.bf16.mxu1 %v2985_v58 }
 0x8ba   : > { %v2028_v27 = vsel %vm577_vm1, %v2016_v57, 0.0 }
 0x8bc   : > { %3476 = vmatpush3.bf16.msra.mxu1 %v2985_v58  ;;  %v2019_v58 = vmul.f32 %v4264_v0, %v4264_v0 }
 0x8bd   : > { %3478 = vmatprep.subr.bf16.mxu1 %v2986_v42 }
 0x8c0   : > { %3480 = vmatpush3.bf16.msra.mxu1 %v2986_v42  ;;  %v2018_v42 = vmul.f32 %v4271_v2, %v4271_v2 }
 0x8c1   : > { %3482 = vmatprep.subr.bf16.mxu1 %v2987_v5 }
 0x8c4   : > { %3484 = vmatpush3.bf16.msra.mxu1 %v2987_v5  ;;  %v2037_v5 = vsel %vm577_vm1, %v2019_v58, 0.0 }
 0x8c5   : > { %3486 = vmatprep.subr.bf16.mxu1 %v2988_v20 }
 0x8c8   : > { %3488 = vmatpush3.bf16.msra.mxu1 %v2988_v20  ;;  %v2034_v20 = vsel %vm577_vm1, %v2018_v42, 0.0 }
 0x8c9   : > { %3490 = vmatprep.subr.bf16.mxu1 %v2989_v61 }
 0x8cc   : > { %3492 = vmatpush3.bf16.msra.mxu1 %v2989_v61  ;;  %v2020_v61 = vmul.f32 %v4284_v46, %v4284_v46 }
 0x8cd   : > { %3494 = vmatprep.subr.bf16.mxu1 %v2990_v7 }
 0x8d0   : > { %3496 = vmatpush3.bf16.msra.mxu1 %v2990_v7  ;;  %v2040_v7 = vsel %vm577_vm1, %v2020_v61, 0.0 }
 0x986   : > { %v3267_v8 = vpop.f32.mrb[20].mxu1 }
 0x987   : > { %v1861_v9 = vadd.f32 %v3267_v8, %v2760_v56  ;;  %v1855_v26 = vpop.f32.mrb[21].mxu1  ;;  %v2991_v8 = vld [vmem:[%s4414_s8 + $0x8] sm:$0xff]  }
 0x988   : > { %v1856_v13 = vadd.f32 %v2760_v56, %v1855_v26  ;;  %v2934_v56 = vld [vmem:[%s4414_s8] sm:$0xff]  }
 0x989   : > { %v1865_v15 = vmul.f32 %v1861_v9, %v1861_v9  ;;  %3498 = vmatprep.subr.bf16.mxu0 %v2934_v56 }
 0x98a   : > { %v1864_v22 = vmul.f32 %v1856_v13, %v1856_v13  ;;  %3500 = vmatpush3.bf16.msra.mxu0 %v2934_v56 }
 0x98b   : > { %v1867_v25 = vmul.f32 %v1865_v15, %v1861_v9  ;;  %3502 = vmatprep.subr.bf16.mxu0 %v2991_v8 }
 0x98c   : > { %v1866_v29 = vmul.f32 %v1864_v22, %v1856_v13 }
 0x98d   : > { %v1869_v30 = vmul.f32 0.044715, %v1867_v25 }
 0x98e   : > { %v1868_v31 = vmul.f32 0.044715, %v1866_v29  ;;  %3504 = vmatpush3.bf16.msra.mxu0 %v2991_v8  ;;  %v2942_v8 = vld [vmem:[%s4415_s9] sm:$0xff]  }
 0x98f   : > { %v1871_v34 = vadd.f32 %v1869_v30, %v1861_v9  ;;  %3506 = vmatprep.subr.bf16.mxu0 %v2942_v8 }
 0x990   : > { %v1870_v36 = vadd.f32 %v1868_v31, %v1856_v13 }
 0x991   : > { %v1873_v44 = vmul.f32 0.7978846, %v1871_v34 }
 0x992   : > { %v1872_v4 = vmul.f32 0.7978846, %v1870_v36 }
 0x993   : > { %3631 = vtanh.f32 %v1873_v44 }
 0x994   : > { %3633 = vtanh.f32 %v1872_v4 }
 0x99d   : > { %v3632_v12 = vpop.eup %3631 }
 0x99e   : > { %v3634_v45 = vpop.eup %3633  ;;  %v1877_v47 = vadd.f32 1.0, %v3632_v12 }
 0x99f   : > { %v1876_v52 = vadd.f32 1.0, %v3634_v45 }
 0x9a0   : > { %v1879_v23 = vmul.f32 0.5, %v1877_v47 }
 0x9a1   : > { %v1878_v54 = vmul.f32 0.5, %v1876_v52 }
 0x9a2   : > { %v1881_v55 = vmul.f32 %v1879_v23, %v1861_v9 }
 0x9a3   : > { %v1880_v39 = vmul.f32 %v1878_v54, %v1856_v13 }
 0x9a5   : > { %3300 = vmatprep.mubr.f32.mxu1 %v1880_v39 }
 0x9a6   : > { %3301 = vmatmul.mubr.f32.vlgmr.msra.gmra.mrb[22].mxu1 %v1881_v55 }
 0xa79   : > { %v3302_v53 = vpop.f32.mrb[22].mxu1 }
 0xa7a   : > { %v1991_v43 = vadd.f32 %v3302_v53, %v2763_v49  ;;  %v1985_v48 = vpop.f32.mrb[23].mxu1 }
 0xa7b   : > { %v1986_v16 = vadd.f32 %v2763_v49, %v1985_v48 }
 0xa7c   : > { %v1995_v3 = vadd.f32 %v4175_v14, %v1991_v43 }
 0xa7d   : > { %v1994_v63 = vadd.f32 %v4177_v19, %v1986_v16  ;;  %v2014_v19 = vmul.f32 %v4244_v40, %v4244_v40 }
 0xa7e   : > { %v2249_v37 = vsel %vm1072_vm2, %v1995_v3, 0.0 }
 0xa7f   : > { %2250 = vadd.xlane.f32.xlu1 %v2249_v37  ;;  %v2246_v14 = vsel %vm1072_vm2, %v1994_v63, 0.0  ;;  %v2022_v50 = vsel %vm577_vm1, %v2014_v19, 0.0 }
 0xa80   : > { %2247 = vadd.xlane.f32.xlu0 %v2246_v14 }
 0xa83   : > { %2026 = vadd.xlane.f32.xlu1 %v2025_v59  ;;  %v2765_v59 = vld [vmem:[%s4407_s1 + $0xf] ss:$0 sm:$0xff] }
 0xa84   : > { %2023 = vadd.xlane.f32.xlu0 %v2022_v50 }
 0xa87   : > { %2032 = vadd.xlane.f32.xlu1 %v2031_v32 }
 0xa88   : > { %2029 = vadd.xlane.f32.xlu0 %v2028_v27 }
 0xa8b   : > { %2038 = vadd.xlane.f32.xlu1 %v2037_v5 }
 0xa8c   : > { %2035 = vadd.xlane.f32.xlu0 %v2034_v20 }
 0xa8f   : > { %2044 = vadd.xlane.f32.xlu1 %v2043_v10 }
 0xa90   : > { %2041 = vadd.xlane.f32.xlu0 %v2040_v7 }
 0xb0c   : > { %v2251_v9 = vpop.xlane.xlu1 %2250 }
 0xb0d   : > { %v2253_v26 = vmul.f32 0.015625, %v2251_v9  ;;  %v2248_v13 = vpop.xlane.xlu0 %2247 }
 0xb0e   : > { %v2252_v15 = vmul.f32 0.015625, %v2248_v13 }
 0xb0f   : > { %v4303_v22 = vsub.f32 %v1995_v3, %v2253_v26 }
 0xb10   : > { %v4305_v25 = vsub.f32 %v1994_v63, %v2252_v15  ;;  %v2027_v29 = vpop.xlane.xlu1 %2026 }
 0xb11   : > { %v2047_v30 = vmul.f32 0.03125, %v2027_v29  ;;  %v2024_v31 = vpop.xlane.xlu0 %2023  ;;  %v2257_v34 = vmul.f32 %v4303_v22, %v4303_v22 }
 0xb12   : > { %v2046_v36 = vmul.f32 0.03125, %v2024_v31  ;;  %v2256_v44 = vmul.f32 %v4305_v25, %v4305_v25 }
 0xb13   : > { %v2055_v4 = vadd.f32 1e-05, %v2047_v30  ;;  %v2261_v12 = vsel %vm1072_vm2, %v2257_v34, 0.0  ;;  %v2992_v30 = vld [vmem:[%s4415_s9 + $0x8] sm:$0xff]   ;;  %v2994_v34 = vld [vmem:[%s4415_s9 + $0x18] sm:$0xff]  }
 0xb14   : > { %v2054_v45 = vadd.f32 1e-05, %v2046_v36  ;;  %2262 = vadd.xlane.f32.xlu1 %v2261_v12  ;;  %v2033_v47 = vpop.xlane.xlu1 %2032  ;;  %v2258_v52 = vsel %vm1072_vm2, %v2256_v44, 0.0  ;;  %v2958_v36 = vld [vmem:[%s4416_s10] sm:$0xff]  }
 0xb15   : > { %3635 = vrsqrt.f32 %v2055_v4  ;;  %v2049_v23 = vmul.f32 0.03125, %v2033_v47  ;;  %2259 = vadd.xlane.f32.xlu0 %v2258_v52  ;;  %v2030_v54 = vpop.xlane.xlu0 %2029  ;;  %3522 = vmatprep.subr.bf16.mxu1 %v2958_v36 }
 0xb16   : > { %3637 = vrsqrt.f32 %v2054_v45  ;;  %v2048_v39 = vmul.f32 0.03125, %v2030_v54  ;;  %3524 = vmatpush3.bf16.msra.mxu1 %v2958_v36  ;;  %v2775_v54 = vld [vmem:[%s4407_s1 + $0x10] ss:$0 sm:$0xff] }
 0xb17   : > { %v2057_v55 = vadd.f32 1e-05, %v2049_v23 }
 0xb18   : > { %v2056_v33 = vadd.f32 1e-05, %v2048_v39  ;;  %v2039_v28 = vpop.xlane.xlu1 %2038 }
 0xb19   : > { %3639 = vrsqrt.f32 %v2057_v55  ;;  %v2051_v49 = vmul.f32 0.03125, %v2039_v28  ;;  %v2036_v53 = vpop.xlane.xlu0 %2035  ;;  %v2776_v28 = vld [vmem:[%s4407_s1 + $0x11] ss:$0 sm:$0xff] }
 0xb1a   : > { %3641 = vrsqrt.f32 %v2056_v33  ;;  %v2050_v41 = vmul.f32 0.03125, %v2036_v53 }
 0xb1b   : > { %v2059_v43 = vadd.f32 1e-05, %v2051_v49 }
 0xb1c   : > { %v2058_v48 = vadd.f32 1e-05, %v2050_v41  ;;  %v2045_v11 = vpop.xlane.xlu1 %2044 }
 0xb1d   : > { %3643 = vrsqrt.f32 %v2059_v43  ;;  %v2053_v16 = vmul.f32 0.03125, %v2045_v11  ;;  %v2042_v3 = vpop.xlane.xlu0 %2041 }
 0xb1e   : > { %3645 = vrsqrt.f32 %v2058_v48  ;;  %v2052_v63 = vmul.f32 0.03125, %v2042_v3 }
 0xb1f   : > { %v3636_v62 = vpop.eup %3635  ;;  %v2061_v37 = vadd.f32 1e-05, %v2053_v16 }
 0xb20   : > { %v3638_v17 = vpop.eup %3637  ;;  %v2071_v14 = vmul.f32 %v3636_v62, %v4240_v38  ;;  %v2060_v19 = vadd.f32 1e-05, %v2052_v63 }
 0xb21   : > { %3647 = vrsqrt.f32 %v2061_v37  ;;  %v2070_v24 = vmul.f32 %v3638_v17, %v4244_v40  ;;  %v2995_v37 = vld [vmem:[%s4416_s10 + $0x8] sm:$0xff]   ;;  %v2777_v17 = vld [vmem:[%s4407_s1 + $0x13] ss:$0 sm:$0xff] }
 0xb22   : > { %3649 = vrsqrt.f32 %v2060_v19  ;;  %v2083_v1 = vmul.f32 %v2764_v18, %v2071_v14  ;;  %3526 = vmatprep.subr.bf16.mxu1 %v2995_v37 }
 0xb23   : > { %v3640_v21 = vpop.eup %3639  ;;  %v2082_v50 = vmul.f32 %v2764_v18, %v2070_v24  ;;  %3528 = vmatpush3.bf16.msra.mxu1 %v2995_v37 }
 0xb24   : > { %v3642_v57 = vpop.eup %3641  ;;  %v2073_v32 = vmul.f32 %v3640_v21, %v4250_v35  ;;  %v2095_v42 = vadd.f32 %v2765_v59, %v2083_v1 }
 0xb25   : > { %v2094_v58 = vadd.f32 %v2765_v59, %v2082_v50  ;;  %v2072_v27 = vmul.f32 %v3642_v57, %v4257_v60 }
 0xb26   : > { %v2085_v38 = vmul.f32 %v2764_v18, %v2073_v32 }
 0xb27   : > { %v3644_v5 = vpop.eup %3643  ;;  %3311 = vmatprep.mubr.msk.f32.mxu0 %vm577_vm1, %v2094_v58  ;;  %v2084_v40 = vmul.f32 %v2764_v18, %v2072_v27 }
 0xb28   : > { %v3646_v6 = vpop.eup %3645  ;;  %3312 = vmatmul.mubr.msk.f32.vlgmr.msra.gmra.mrb[6].mxu0 %vm577_vm1, %v2095_v42  ;;  %v2075_v20 = vmul.f32 %v3644_v5, %v4264_v0  ;;  %v2097_v7 = vadd.f32 %v2765_v59, %v2085_v38 }
 0xb29   : > { %v2096_v61 = vadd.f32 %v2765_v59, %v2084_v40  ;;  %v2074_v10 = vmul.f32 %v3646_v6, %v4271_v2  ;;  %3508 = vmatpush3.bf16.msra.mxu0 %v2942_v8  ;;  %v3669_v8 = vmov 32  }
 0xb2a   : > { %v2087_v56 = vmul.f32 %v2764_v18, %v2075_v20  ;;  %3510 = vmatprep.subr.bf16.mxu0 %v2992_v30  ;;  %3574 = vset.pattern.permute.xlu0 %v3669_v8 }
 0xb2b   : > { %v3648_v35 = vpop.eup %3647  ;;  %3314 = vmatprep.mubr.msk.f32.mxu0 %vm577_vm1, %v2096_v61  ;;  %v2086_v60 = vmul.f32 %v2764_v18, %v2074_v10 }
 0xb2c   : > { %v3650_v9 = vpop.eup %3649  ;;  %3315 = vmatmul.mubr.msk.f32.gmra.mrb[8].mxu0 %vm577_vm1, %v2097_v7  ;;  %v2077_v26 = vmul.f32 %v3648_v35, %v4278_v51  ;;  %v2099_v2 = vadd.f32 %v2765_v59, %v2087_v56  ;;  %v2993_v51 = vld [vmem:[%s4415_s9 + $0x10] sm:$0xff]   ;;  %v3666_v56 = vmov 0.0|0.0   ;;  %v3668_v35 = vmov 0.0  }
 0xb2d   : > { %v2098_v0 = vadd.f32 %v2765_v59, %v2086_v60  ;;  %v2076_v13 = vmul.f32 %v3650_v9, %v4284_v46  ;;  %3512 = vmatpush3.bf16.msra.mxu0 %v2992_v30  ;;  %v2552_v60 = vld [vmem:[%s4417_s11] sm:$0xff]  ;;  %v2780_v9 = vld [vmem:[%s4407_s1 + $0x14] ss:$0 sm:$0xff] }
 0xb2e   : > { %v2089_v15 = vmul.f32 %v2764_v18, %v2077_v26  ;;  %3514 = vmatprep.subr.bf16.mxu0 %v2993_v51  ;;  %2555 = vperm.xlu0 %3574, %v2552_v60  }
 0xb2f   : > { %3317 = vmatprep.mubr.msk.f32.mxu0 %vm577_vm1, %v2098_v0  ;;  %v2088_v29 = vmul.f32 %v2764_v18, %v2076_v13  ;;  %v2766_v18 = vld [vmem:[%s4407_s1 + $0x12] ss:$0 sm:$0xff] }
 0xb30   : > { %3318 = vmatmul.mubr.msk.f32.gmra.mrb[10].mxu0 %vm577_vm1, %v2099_v2  ;;  %v2101_v46 = vadd.f32 %v2765_v59, %v2089_v15 }
 0xb31   : > { %v2100_v31 = vadd.f32 %v2765_v59, %v2088_v29  ;;  %3516 = vmatpush3.bf16.msra.mxu0 %v2993_v51 }
 0xb32   : > { %3518 = vmatprep.subr.bf16.mxu0 %v2994_v34 }
 0xb33   : > { %3320 = vmatprep.mubr.msk.f32.mxu0 %vm577_vm1, %v2100_v31 }
 0xb34   : > { %3321 = vmatmul.mubr.msk.f32.gmra.mrb[12].mxu0 %vm577_vm1, %v2101_v46 }
 0xb35   : > { %3520 = vmatpush3.bf16.msra.mxu0 %v2994_v34 }
 0xb36   : > { %3529 = vmatprep.subr.bf16.mxu0 %v3666_v56 }
 0xba1   : > { %v2263_v44 = vpop.xlane.xlu1 %2262 }
 0xba2   : > { %v2265_v4 = vmul.f32 0.015625, %v2263_v44  ;;  %v2260_v12 = vpop.xlane.xlu0 %2259 }
 0xba3   : > { %v2264_v45 = vmul.f32 0.015625, %v2260_v12 }
 0xba4   : > { %v2267_v47 = vadd.f32 1e-05, %v2265_v4 }
 0xba5   : > { %v2266_v52 = vadd.f32 1e-05, %v2264_v45 }
 0xba6   : > { %3651 = vrsqrt.f32 %v2267_v47 }
 0xba7   : > { %3653 = vrsqrt.f32 %v2266_v52 }
 0xbb0   : > { %v3652_v23 = vpop.eup %3651 }
 0xbb1   : > { %v3654_v39 = vpop.eup %3653  ;;  %v2271_v55 = vmul.f32 %v3652_v23, %v4303_v22 }
 0xbb2   : > { %v2270_v33 = vmul.f32 %v3654_v39, %v4305_v25 }
 0xbb3   : > { %v2277_v49 = vmul.f32 %v2775_v54, %v2271_v55 }
 0xbb4   : > { %v2276_v53 = vmul.f32 %v2775_v54, %v2270_v33 }
 0xbb5   : > { %v2283_v43 = vadd.f32 %v2776_v28, %v2277_v49 }
 0xbb6   : > { %v2282_v41 = vadd.f32 %v2776_v28, %v2276_v53 }
 0xbb8   : > { %3339 = vmatprep.mubr.msk.f32.mxu0 %vm1072_vm2, %v2282_v41 }
 0xbb9   : > { %3340 = vmatmul.mubr.msk.f32.vlgmr.msra.gmra.mrb[14].mxu0 %vm1072_vm2, %v2283_v43 }
 0xbba   : > { %3378 = vmatprep.mubr.msk.f32.mxu0 %vm3667_vm3, %v3668_v35 }
 0xbfb   : > { %v3313_v48 = vpop.f32.mrb[6].mxu0 }
 0xbfc   : > { %v2205_v11 = vpop.f32.mrb[7].mxu0  ;;  %v2211_v14 = vadd.f32 %v3313_v48, %v2766_v18 }
 0xbfd   : > { %v2206_v19 = vadd.f32 %v2766_v18, %v2205_v11 }
 0xbff   : > { %v3316_v16 = vpop.f32.mrb[8].mxu0 }
 0xc00   : > { %v2215_v3 = vpop.f32.mrb[9].mxu0  ;;  %v2221_v59 = vadd.f32 %v3316_v16, %v2766_v18 }
 0xc01   : > { %v2216_v32 = vadd.f32 %v2766_v18, %v2215_v3 }
 0xc03   : > { %v3319_v63 = vpop.f32.mrb[10].mxu0 }
 0xc04   : > { %v2225_v22 = vpop.f32.mrb[11].mxu0  ;;  %v2231_v1 = vadd.f32 %v3319_v63, %v2766_v18 }
 0xc05   : > { %v2226_v58 = vadd.f32 %v2766_v18, %v2225_v22 }
 0xc07   : > { %v3322_v62 = vpop.f32.mrb[12].mxu0 }
 0xc08   : > { %v2235_v25 = vpop.f32.mrb[13].mxu0  ;;  %v2241_v21 = vadd.f32 %v3322_v62, %v2766_v18 }
 0xc09   : > { %v2236_v27 = vadd.f32 %v2766_v18, %v2235_v25  ;;  %v2556_v18 = vpop.permute.xlu0 %2555 }
 0xc8c   : > { %v3341_v24 = vpop.f32.mrb[14].mxu0 }
 0xc8d   : > { %v2383_v50 = vadd.f32 %v3341_v24, %v2777_v17  ;;  %v2377_v57 = vpop.f32.mrb[15].mxu0 }
 0xc8e   : > { %v2378_v42 = vadd.f32 %v2777_v17, %v2377_v57 }
 0xc8f   : > { %v2387_v38 = vadd.f32 %v2383_v50, %v2211_v14  ;;  %v2389_v5 = vadd.f32 %v2383_v50, %v2221_v59  ;;  %v2391_v40 = vadd.f32 %v2383_v50, %v2231_v1  ;;  %v2393_v6 = vadd.f32 %v2383_v50, %v2241_v21 }
 0xc90   : > { %v2386_v20 = vadd.f32 %v2378_v42, %v2206_v19  ;;  %v2388_v61 = vadd.f32 %v2378_v42, %v2216_v32  ;;  %v2390_v10 = vadd.f32 %v2378_v42, %v2226_v58  ;;  %v2392_v7 = vadd.f32 %v2378_v42, %v2236_v27 }
 0xc92   : > { %3350 = vmatprep.mubr.msk.f32.mxu1 %vm577_vm1, %v2386_v20 }
 0xc93   : > { %3351 = vmatmul.mubr.msk.f32.vlgmr.msra.gmra.mrb[24].mxu1 %vm577_vm1, %v2387_v38 }
 0xc94   : > { %3353 = vmatprep.mubr.msk.f32.mxu1 %vm577_vm1, %v2388_v61 }
 0xc97   : > { %3354 = vmatmul.mubr.msk.f32.gmra.mrb[26].mxu1 %vm577_vm1, %v2389_v5 }
 0xc98   : > { %3356 = vmatprep.mubr.msk.f32.mxu1 %vm577_vm1, %v2390_v10 }
 0xc9b   : > { %3357 = vmatmul.mubr.msk.f32.gmra.mrb[28].mxu1 %vm577_vm1, %v2391_v40 }
 0xc9c   : > { %3359 = vmatprep.mubr.msk.f32.mxu1 %vm577_vm1, %v2392_v7 }
 0xc9f   : > { %3360 = vmatmul.mubr.msk.f32.gmra.mrb[30].mxu1 %vm577_vm1, %v2393_v6 }
 0xd66   : > { %v3352_v26 = vpop.f32.mrb[24].mxu1 }
 0xd67   : > { %v2503_v0 = vadd.f32 %v3352_v26, %v2780_v9  ;;  %v2497_v13 = vpop.f32.mrb[25].mxu1 }
 0xd68   : > { %v2498_v2 = vadd.f32 %v2780_v9, %v2497_v13 }
 0xd69   : > { %v2537_v15 = vmax.f32 %v2503_v0, 0.0 }
 0xd6a   : > { %v2536_v29 = vmax.f32 %v2498_v2, 0.0  ;;  %v3355_v30 = vpop.f32.mrb[26].mxu1 }
 0xd6b   : > { %v2545_v31 = vadd.f32 %v2537_v15, %v2387_v38  ;;  %v2513_v51 = vadd.f32 %v3355_v30, %v2780_v9  ;;  %v2507_v46 = vpop.f32.mrb[27].mxu1 }
 0xd6c   : > { %v2544_v34 = vadd.f32 %v2536_v29, %v2386_v20  ;;  %v2508_v36 = vadd.f32 %v2780_v9, %v2507_v46 }
 0xd6d   : > { %v2539_v44 = vmax.f32 %v2513_v51, 0.0 }
 0xd6e   : > { %v3530_v12 = vpack.c.bf16 %v2545_v31, %v2544_v34  ;;  %v2538_v45 = vmax.f32 %v2508_v36, 0.0  ;;  %v3358_v47 = vpop.f32.mrb[28].mxu1 }
 0xd6f   : > { %v2547_v52 = vadd.f32 %v2539_v44, %v2389_v5  ;;  %v2523_v23 = vadd.f32 %v3358_v47, %v2780_v9  ;;  %v2517_v54 = vpop.f32.mrb[29].mxu1 }
 0xd70   : > { %v2546_v39 = vadd.f32 %v2538_v45, %v2388_v61  ;;  %v2518_v55 = vadd.f32 %v2780_v9, %v2517_v54  ;;  %3532 = vmatpush3.bf16.xpose.msk.msra.mxu0 %vm4385_vm4, %v3530_v12 }
 0xd71   : > { %v2541_v33 = vmax.f32 %v2523_v23, 0.0  ;;  %3533 = vmatprep.subr.bf16.mxu0 %v3666_v56 }
 0xd72   : > { %v3534_v28 = vpack.c.bf16 %v2547_v52, %v2546_v39  ;;  %v2540_v49 = vmax.f32 %v2518_v55, 0.0  ;;  %v3361_v53 = vpop.f32.mrb[30].mxu1 }
 0xd73   : > { %v2549_v41 = vadd.f32 %v2541_v33, %v2391_v40  ;;  %v2533_v43 = vadd.f32 %v3361_v53, %v2780_v9  ;;  %v2527_v48 = vpop.f32.mrb[31].mxu1 }
 0xd74   : > { %v2548_v11 = vadd.f32 %v2540_v49, %v2390_v10  ;;  %v2528_v16 = vadd.f32 %v2780_v9, %v2527_v48 }
 0xd75   : > { %v2543_v3 = vmax.f32 %v2533_v43, 0.0 }
 0xd76   : > { %v3538_v63 = vpack.c.bf16 %v2549_v41, %v2548_v11  ;;  %v2542_v22 = vmax.f32 %v2528_v16, 0.0 }
 0xd77   : > { %v2551_v62 = vadd.f32 %v2543_v3, %v2393_v6 }
 0xd78   : > { %v2550_v25 = vadd.f32 %v2542_v22, %v2392_v7  ;;  %3536 = vmatpush3.bf16.xpose.msk.msra.mxu0 %vm4385_vm4, %v3534_v28 }
 0xd79   : > { %3537 = vmatprep.subr.bf16.mxu0 %v3666_v56 }
 0xd7a   : > { %v3542_v37 = vpack.c.bf16 %v2551_v62, %v2550_v25 }
 0xd80   : > { %3540 = vmatpush3.bf16.xpose.msk.msra.mxu0 %vm4385_vm4, %v3538_v63 }
 0xd81   : > { %3541 = vmatprep.subr.bf16.mxu0 %v3666_v56 }
 0xd88   : > { %3544 = vmatpush3.bf16.xpose.msk.msra.mxu0 %vm4385_vm4, %v3542_v37 }
 0xd8f   : > { %3379 = vmatmul.mubr.msk.f32.vlgmr.msra.gmra.mrb[16].mxu0 %vm577_vm1, %v2552_v60 }
 0xe62   : > { %v2650_v17 = vpop.f32.mrb[16].mxu0 }
 0xe63   : > { %v2651_v14 = vadd.f32 %v2650_v17, %v2556_v18  ;;  %v3380_v19 = vpop.f32.mrb[17].mxu0 }
 0xe65   : > { %2654 = vst.msk [vmem:[%s411_s23] sm:$0xff] %vm1072_vm2, %v2651_v14 }
 0xe66 PF: > { %s22_s21 = sadd.s32 1, %s3661_s21  }
 0xe67   : > { %p19_p4 = scmp.ge.s32.totalorder %s22_s21, 4  }
 0xe69   :  { %21 = sbr.rel (!%p19_p4) target bundleno = 1 (0x1), region = 98 }

</bundles_post_ra>
